<compile_context>
chip_gen: v6e
topology: v6e:2x2x1
jax: 0.10.0
libtpu: 0.0.40
codegen_flags: <defaults>
</compile_context>

<pallas_src>
import functools

import jax
import jax.numpy as jnp
from jax.experimental import pallas as pl
from jax.experimental.pallas import tpu as pltpu


def rcab_kernel(x_ref, w1_ref, b1_ref, w2_ref, b2_ref,
                wd1_ref, bd1_ref, wd2_ref, bd2_ref, out_ref,
                *, height, width, compute_dtype):
    # x_ref   : (1, C, H*W)  channels on sublanes, pixels on (dense) lanes
    # w1/w2   : (C, 9*C)     conv weights, w[co, t*C + ci] with t = ky*3 + kx
    # b1/b2   : (C, 1)
    # wd1     : (C, Cr), bd1: (Cr, 1)   squeeze 1x1 conv (wd1[c, j] = torch W1[j, c])
    # wd2     : (C, Cr), bd2: (C, 1)    excite  1x1 conv (wd2[c, j] = torch W2[c, j])
    C = x_ref.shape[1]
    hw = height * width
    taps = [(ky - 1, kx - 1) for ky in range(3) for kx in range(3)]

    def conv3x3_same(inp, w, b):
        """inp: (C, H*W) -> (C, H*W) float32 (f32 accumulation)."""
        inp = inp.astype(compute_dtype)
        # zero-pad the flattened pixel axis once; each tap becomes a static lane slice.
        zpad = jnp.zeros((C, width + 1), compute_dtype)
        inp_pad = jnp.concatenate([zpad, inp, zpad], axis=1)      # (C, HW + 2W + 2)
        # x coordinate of every pixel along the lane axis (for left/right boundary masks)
        x_idx = jax.lax.broadcasted_iota(jnp.int32, (C, hw), 1) % width

        cols = []
        for dy, dx in taps:
            off = (width + 1) + dy * width + dx                   # static, >= 0
            col = inp_pad[:, off:off + hw]                        # shifted patch
            # y-out-of-range sources fall into the zero padding automatically;
            # only row-wrap along x needs masking.
            if dx > 0:
                col = jnp.where(x_idx < (width - dx), col, 0.0)
            elif dx < 0:
                col = jnp.where(x_idx >= -dx, col, 0.0)
            cols.append(col)
        # sublane concat at C-aligned (multiple-of-8) offsets: essentially free placement.
        cols = jnp.concatenate(cols, axis=0)                      # (9C, HW)
        # single MXU matmul per conv, K = 9C, f32 accumulation; one bias add.
        return jnp.dot(w, cols, preferred_element_type=jnp.float32) + b

    x = x_ref[0]                                                  # (C, HW) float32

    h1 = jnp.maximum(conv3x3_same(x, w1_ref[...], b1_ref[...]), 0.0)
    h2 = conv3x3_same(h1, w2_ref[...], b2_ref[...])               # (C, HW) float32

    # ---- channel attention: GAP -> 1x1 squeeze -> ReLU -> 1x1 excite -> sigmoid ----
    pooled = jnp.mean(h2, axis=1, keepdims=True)                  # (C, 1) lane reduction
    wd1 = wd1_ref[...]                                            # (C, Cr)
    wd2 = wd2_ref[...]                                            # (C, Cr)
    bd1 = bd1_ref[...]                                            # (Cr, 1)
    cr = wd1.shape[1]
    y2 = bd2_ref[...]                                             # (C, 1)
    for j in range(cr):                                           # Cr tiny: keep off MXU
        y1_j = jnp.sum(wd1[:, j:j + 1] * pooled, axis=0, keepdims=True) + bd1[j:j + 1, :]
        y1_j = jnp.maximum(y1_j, 0.0)                             # (1, 1)
        y2 = y2 + wd2[:, j:j + 1] * y1_j                          # (C, 1)
    scale = jax.nn.sigmoid(y2)                                    # (C, 1), EUP

    # ---- channel scale + residual; lane-dense store ----
    out_ref[0] = (h2 * scale + x).astype(out_ref.dtype)


def rcab_forward(x_nchw, params, *, compute_dtype=jnp.float32):
    """x_nchw: (N, C, H, W) float32. Returns (N, C, H, W) float32."""
    w1, b1, w2, b2, wd1, bd1, wd2, bd2 = params
    N, C, H, W = x_nchw.shape
    HW = H * W
    Cr = wd1.shape[1]

    x2d = x_nchw.reshape(N, C, HW)                                # NCHW is already channel-major
    # conv weights (9, C_in, C_out) -> (C_out, 9*C_in) so each conv is one matmul
    w1k = jnp.transpose(w1, (2, 0, 1)).reshape(C, 9 * C).astype(compute_dtype)
    w2k = jnp.transpose(w2, (2, 0, 1)).reshape(C, 9 * C).astype(compute_dtype)
    b1k = b1.reshape(C, 1)
    b2k = b2.reshape(C, 1)
    wd1k = wd1                                                    # (C, Cr)
    wd2k = wd2.T                                                  # (Cr, C) -> (C, Cr)
    bd1k = bd1.reshape(Cr, 1)
    bd2k = bd2.reshape(C, 1)

    kernel = functools.partial(rcab_kernel, height=H, width=W,
                               compute_dtype=compute_dtype)

    flops = N * 2 * (2 * C * (9 * C) * HW)                        # two 3x3 convs as matmuls
    bytes_accessed = 4 * (2 * N * C * HW + 2 * C * 9 * C + 4 * C + 2 * C * Cr + Cr)

    # NOTE: weight/bias blocks are grid-invariant; at production C they could be
    # single-buffered (pipeline_mode=pl.Buffered(1)) to save VMEM — immaterial at C=32.
    out2d = pl.pallas_call(
        kernel,
        out_shape=jax.ShapeDtypeStruct((N, C, HW), x_nchw.dtype),
        grid_spec=pltpu.PrefetchScalarGridSpec(
            num_scalar_prefetch=0,
            grid=(N,),
            in_specs=[
                pl.BlockSpec((1, C, HW), lambda n: (n, 0, 0)),    # x
                pl.BlockSpec((C, 9 * C), lambda n: (0, 0)),       # w1
                pl.BlockSpec((C, 1), lambda n: (0, 0)),           # b1
                pl.BlockSpec((C, 9 * C), lambda n: (0, 0)),       # w2
                pl.BlockSpec((C, 1), lambda n: (0, 0)),           # b2
                pl.BlockSpec((C, Cr), lambda n: (0, 0)),          # wd1
                pl.BlockSpec((Cr, 1), lambda n: (0, 0)),          # bd1
                pl.BlockSpec((C, Cr), lambda n: (0, 0)),          # wd2 (transposed)
                pl.BlockSpec((C, 1), lambda n: (0, 0)),           # bd2
            ],
            out_specs=pl.BlockSpec((1, C, HW), lambda n: (n, 0, 0)),
        ),
        compiler_params=pltpu.CompilerParams(
            dimension_semantics=("parallel",)),
        cost_estimate=pl.CostEstimate(flops=flops, transcendentals=N * C,
                                      bytes_accessed=bytes_accessed),
    )(x2d, w1k, b1k, w2k, b2k, wd1k, bd1k, wd2k, bd2k)
    return out2d.reshape(N, C, H, W)


def rcab_reference_nhwc(x, params):
    """Pure-JAX reference (NHWC) for numerical validation."""
    w1, b1, w2, b2, wd1, bd1, wd2, bd2 = params

    def conv3x3(inp, w, b):
        w_hwio = w.reshape(3, 3, inp.shape[-1], -1)
        out = jax.lax.conv_general_dilated(
            inp, w_hwio, window_strides=(1, 1), padding="SAME",
            dimension_numbers=("NHWC", "HWIO", "NHWC"))
        return out + b.reshape(1, 1, 1, -1)

    h1 = jnp.maximum(conv3x3(x, w1, b1), 0.0)
    h2 = conv3x3(h1, w2, b2)
    pooled = jnp.mean(h2, axis=(1, 2))                            # (N, C)
    y1 = jnp.maximum(pooled @ wd1 + bd1, 0.0)
    y2 = jax.nn.sigmoid(y1 @ wd2 + bd2)
    return h2 * y2[:, None, None, :] + x


def make_params(key, n_feat, reduction):
    C, Cr = n_feat, n_feat // reduction
    ks = jax.random.split(key, 8)
    s_conv = 1.0 / jnp.sqrt(9.0 * C)
    s_du1 = 1.0 / jnp.sqrt(1.0 * C)
    s_du2 = 1.0 / jnp.sqrt(1.0 * Cr)
    w1 = jax.random.normal(ks[0], (9, C, C), jnp.float32) * s_conv
    b1 = jax.random.normal(ks[1], (1, C), jnp.float32) * s_conv
    w2 = jax.random.normal(ks[2], (9, C, C), jnp.float32) * s_conv
    b2 = jax.random.normal(ks[3], (1, C), jnp.float32) * s_conv
    wd1 = jax.random.normal(ks[4], (C, Cr), jnp.float32) * s_du1
    bd1 = jax.random.normal(ks[5], (1, Cr), jnp.float32) * s_du1
    wd2 = jax.random.normal(ks[6], (Cr, C), jnp.float32) * s_du2
    bd2 = jax.random.normal(ks[7], (1, C), jnp.float32) * s_du2
    return (w1, b1, w2, b2, wd1, bd1, wd2, bd2)


if __name__ == "__main__":
    N, n_feat, H, W = 2, 32, 16, 16
    reduction = 16

    key = jax.random.PRNGKey(0)
    k_x, k_p = jax.random.split(key)
    x_nchw = jax.random.normal(k_x, (N, n_feat, H, W), jnp.float32)
    params = make_params(k_p, n_feat, reduction)

    ref = rcab_reference_nhwc(jnp.transpose(x_nchw, (0, 2, 3, 1)), params)
    ref = jnp.transpose(ref, (0, 3, 1, 2))

    # f32 matmul operands (exact; recommended on v5e)
    out = jax.block_until_ready(jax.jit(rcab_forward)(x_nchw, params))
    assert out.shape == x_nchw.shape and out.dtype == x_nchw.dtype
    err = jnp.max(jnp.abs(out - ref))
    assert jnp.allclose(out, ref, atol=1e-4, rtol=1e-4), f"f32 max abs err {err}"

    # bf16 matmul operands with f32 accumulation (recommended on v6e / v7x MXUs)
    fwd_bf16 = jax.jit(functools.partial(rcab_forward, compute_dtype=jnp.bfloat16))
    out_bf16 = jax.block_until_ready(fwd_bf16(x_nchw, params))
    err_bf16 = jnp.max(jnp.abs(out_bf16 - ref))
    assert jnp.allclose(out_bf16, ref, atol=5e-2, rtol=5e-2), \
        f"bf16 max abs err {err_bf16}"

    print("KERNEL_OK")
</pallas_src>

<mosaic_0001>
module attributes {stable_mosaic.version = 11 : i64} {
  func.func @rcab_kernel(%arg0: i32, %arg1: memref<1x32x256xf32, #tpu.memory_space<vmem>>, %arg2: memref<32x288xf32, #tpu.memory_space<vmem>>, %arg3: memref<32x1xf32, #tpu.memory_space<vmem>>, %arg4: memref<32x288xf32, #tpu.memory_space<vmem>>, %arg5: memref<32x1xf32, #tpu.memory_space<vmem>>, %arg6: memref<32x2xf32, #tpu.memory_space<vmem>>, %arg7: memref<2x1xf32, #tpu.memory_space<vmem>>, %arg8: memref<32x2xf32, #tpu.memory_space<vmem>>, %arg9: memref<32x1xf32, #tpu.memory_space<vmem>>, %arg10: memref<1x32x256xf32, #tpu.memory_space<vmem>>) attributes {dimension_semantics = [#tpu.dimension_semantics<parallel>], iteration_bounds = array<i64: 2>, scalar_prefetch = 0 : i64, scratch_operands = 0 : i64, tpu.core_type = #tpu.core_type<tc>, window_params = [{transform_indices = @transform_0, window_bounds = array<i64: 1, 32, 256>}, {pipeline_mode = #tpu.pipeline_mode<synchronous>, transform_indices = @transform_1, window_bounds = array<i64: 32, 288>}, {pipeline_mode = #tpu.pipeline_mode<synchronous>, transform_indices = @transform_2, window_bounds = array<i64: 32, 1>}, {pipeline_mode = #tpu.pipeline_mode<synchronous>, transform_indices = @transform_3, window_bounds = array<i64: 32, 288>}, {pipeline_mode = #tpu.pipeline_mode<synchronous>, transform_indices = @transform_4, window_bounds = array<i64: 32, 1>}, {pipeline_mode = #tpu.pipeline_mode<synchronous>, transform_indices = @transform_5, window_bounds = array<i64: 32, 2>}, {pipeline_mode = #tpu.pipeline_mode<synchronous>, transform_indices = @transform_6, window_bounds = array<i64: 2, 1>}, {pipeline_mode = #tpu.pipeline_mode<synchronous>, transform_indices = @transform_7, window_bounds = array<i64: 32, 2>}, {pipeline_mode = #tpu.pipeline_mode<synchronous>, transform_indices = @transform_8, window_bounds = array<i64: 32, 1>}, {transform_indices = @transform_9, window_bounds = array<i64: 1, 32, 256>}]} {
    %c0 = arith.constant 0 : index
    %c0_0 = arith.constant 0 : index
    %c0_1 = arith.constant 0 : index
    %0 = vector.load %arg1[%c0, %c0_0, %c0_1] : memref<1x32x256xf32, #tpu.memory_space<vmem>>, vector<1x32x256xf32>
    %1 = vector.shape_cast %0 : vector<1x32x256xf32> to vector<32x256xf32>
    %c0_2 = arith.constant 0 : index
    %c0_3 = arith.constant 0 : index
    %2 = vector.load %arg2[%c0_2, %c0_3] : memref<32x288xf32, #tpu.memory_space<vmem>>, vector<32x288xf32>
    %c0_4 = arith.constant 0 : index
    %c0_5 = arith.constant 0 : index
    %3 = vector.load %arg3[%c0_4, %c0_5] : memref<32x1xf32, #tpu.memory_space<vmem>>, vector<32x1xf32>
    %cst = arith.constant 0.000000e+00 : f32
    %4 = vector.broadcast %cst : f32 to vector<32x17xf32>
    %5 = tpu.concatenate %4, %1, %4 in 1 : vector<32x17xf32>, vector<32x256xf32>, vector<32x17xf32> -> vector<32x290xf32>
    %6 = tpu.iota {dimensions = array<i32: 1>} : vector<32x256xi32>
    %c16_i32 = arith.constant 16 : i32
    %c0_i32 = arith.constant 0 : i32
    %7 = arith.cmpi eq, %c16_i32, %c0_i32 : i32
    %c1_i32 = arith.constant 1 : i32
    %8 = arith.select %7, %c1_i32, %c16_i32 : i32
    %9 = vector.broadcast %8 : i32 to vector<32x256xi32>
    %10 = arith.remsi %6, %9 : vector<32x256xi32>
    %c0_i32_6 = arith.constant 0 : i32
    %11 = vector.broadcast %c0_i32_6 : i32 to vector<32x256xi32>
    %12 = arith.cmpi ne, %10, %11 : vector<32x256xi32>
    %c0_i32_7 = arith.constant 0 : i32
    %13 = vector.broadcast %c0_i32_7 : i32 to vector<32x256xi32>
    %14 = arith.cmpi slt, %10, %13 : vector<32x256xi32>
    %c0_i32_8 = arith.constant 0 : i32
    %15 = arith.cmpi slt, %8, %c0_i32_8 : i32
    %16 = vector.broadcast %15 : i1 to vector<32x256xi1>
    %17 = vector.broadcast %16 : vector<32x256xi1> to vector<32x256xi1>
    %18 = arith.xori %14, %17 : vector<32x256xi1>
    %19 = arith.andi %18, %12 : vector<32x256xi1>
    %20 = vector.broadcast %8 : i32 to vector<32x256xi32>
    %21 = arith.addi %10, %20 : vector<32x256xi32>
    %22 = arith.select %19, %21, %10 : vector<32x256xi1>, vector<32x256xi32>
    %23 = vector.extract_strided_slice %5 {offsets = [0, 0], sizes = [32, 256], strides = [1, 1]} : vector<32x290xf32> to vector<32x256xf32>
    %c1_i32_9 = arith.constant 1 : i32
    %24 = vector.broadcast %c1_i32_9 : i32 to vector<32x256xi32>
    %25 = arith.cmpi sge, %22, %24 : vector<32x256xi32>
    %cst_10 = arith.constant 0.000000e+00 : f32
    %26 = vector.broadcast %cst_10 : f32 to vector<32x256xf32>
    %27 = arith.select %25, %23, %26 : vector<32x256xi1>, vector<32x256xf32>
    %28 = vector.extract_strided_slice %5 {offsets = [0, 1], sizes = [32, 256], strides = [1, 1]} : vector<32x290xf32> to vector<32x256xf32>
    %29 = vector.extract_strided_slice %5 {offsets = [0, 2], sizes = [32, 256], strides = [1, 1]} : vector<32x290xf32> to vector<32x256xf32>
    %c15_i32 = arith.constant 15 : i32
    %30 = vector.broadcast %c15_i32 : i32 to vector<32x256xi32>
    %31 = arith.cmpi slt, %22, %30 : vector<32x256xi32>
    %cst_11 = arith.constant 0.000000e+00 : f32
    %32 = vector.broadcast %cst_11 : f32 to vector<32x256xf32>
    %33 = arith.select %31, %29, %32 : vector<32x256xi1>, vector<32x256xf32>
    %34 = vector.extract_strided_slice %5 {offsets = [0, 16], sizes = [32, 256], strides = [1, 1]} : vector<32x290xf32> to vector<32x256xf32>
    %c1_i32_12 = arith.constant 1 : i32
    %35 = vector.broadcast %c1_i32_12 : i32 to vector<32x256xi32>
    %36 = arith.cmpi sge, %22, %35 : vector<32x256xi32>
    %cst_13 = arith.constant 0.000000e+00 : f32
    %37 = vector.broadcast %cst_13 : f32 to vector<32x256xf32>
    %38 = arith.select %36, %34, %37 : vector<32x256xi1>, vector<32x256xf32>
    %39 = vector.extract_strided_slice %5 {offsets = [0, 17], sizes = [32, 256], strides = [1, 1]} : vector<32x290xf32> to vector<32x256xf32>
    %40 = vector.extract_strided_slice %5 {offsets = [0, 18], sizes = [32, 256], strides = [1, 1]} : vector<32x290xf32> to vector<32x256xf32>
    %c15_i32_14 = arith.constant 15 : i32
    %41 = vector.broadcast %c15_i32_14 : i32 to vector<32x256xi32>
    %42 = arith.cmpi slt, %22, %41 : vector<32x256xi32>
    %cst_15 = arith.constant 0.000000e+00 : f32
    %43 = vector.broadcast %cst_15 : f32 to vector<32x256xf32>
    %44 = arith.select %42, %40, %43 : vector<32x256xi1>, vector<32x256xf32>
    %45 = vector.extract_strided_slice %5 {offsets = [0, 32], sizes = [32, 256], strides = [1, 1]} : vector<32x290xf32> to vector<32x256xf32>
    %c1_i32_16 = arith.constant 1 : i32
    %46 = vector.broadcast %c1_i32_16 : i32 to vector<32x256xi32>
    %47 = arith.cmpi sge, %22, %46 : vector<32x256xi32>
    %cst_17 = arith.constant 0.000000e+00 : f32
    %48 = vector.broadcast %cst_17 : f32 to vector<32x256xf32>
    %49 = arith.select %47, %45, %48 : vector<32x256xi1>, vector<32x256xf32>
    %50 = vector.extract_strided_slice %5 {offsets = [0, 33], sizes = [32, 256], strides = [1, 1]} : vector<32x290xf32> to vector<32x256xf32>
    %51 = vector.extract_strided_slice %5 {offsets = [0, 34], sizes = [32, 256], strides = [1, 1]} : vector<32x290xf32> to vector<32x256xf32>
    %c15_i32_18 = arith.constant 15 : i32
    %52 = vector.broadcast %c15_i32_18 : i32 to vector<32x256xi32>
    %53 = arith.cmpi slt, %22, %52 : vector<32x256xi32>
    %cst_19 = arith.constant 0.000000e+00 : f32
    %54 = vector.broadcast %cst_19 : f32 to vector<32x256xf32>
    %55 = arith.select %53, %51, %54 : vector<32x256xi1>, vector<32x256xf32>
    %56 = tpu.concatenate %27, %28, %33, %38, %39, %44, %49, %50, %55 in 0 : vector<32x256xf32>, vector<32x256xf32>, vector<32x256xf32>, vector<32x256xf32>, vector<32x256xf32>, vector<32x256xf32>, vector<32x256xf32>, vector<32x256xf32>, vector<32x256xf32> -> vector<288x256xf32>
    %cst_20 = arith.constant dense<0.000000e+00> : vector<32x256xf32>
    %57 = tpu.matmul %2, %56, %cst_20 {dimension_numbers = #tpu.dot_dimension_numbers<[1], [0], [0], [1], [0, 0, 1, 1], [], []>} : vector<32x288xf32>, vector<288x256xf32>, vector<32x256xf32> -> vector<32x256xf32>
    %58 = vector.broadcast %3 : vector<32x1xf32> to vector<32x256xf32>
    %59 = arith.addf %57, %58 : vector<32x256xf32>
    %cst_21 = arith.constant 0.000000e+00 : f32
    %60 = vector.broadcast %cst_21 : f32 to vector<32x256xf32>
    %61 = arith.maximumf %59, %60 : vector<32x256xf32>
    %c0_22 = arith.constant 0 : index
    %c0_23 = arith.constant 0 : index
    %62 = vector.load %arg4[%c0_22, %c0_23] : memref<32x288xf32, #tpu.memory_space<vmem>>, vector<32x288xf32>
    %c0_24 = arith.constant 0 : index
    %c0_25 = arith.constant 0 : index
    %63 = vector.load %arg5[%c0_24, %c0_25] : memref<32x1xf32, #tpu.memory_space<vmem>>, vector<32x1xf32>
    %cst_26 = arith.constant 0.000000e+00 : f32
    %64 = vector.broadcast %cst_26 : f32 to vector<32x17xf32>
    %65 = tpu.concatenate %64, %61, %64 in 1 : vector<32x17xf32>, vector<32x256xf32>, vector<32x17xf32> -> vector<32x290xf32>
    %66 = tpu.iota {dimensions = array<i32: 1>} : vector<32x256xi32>
    %c16_i32_27 = arith.constant 16 : i32
    %c0_i32_28 = arith.constant 0 : i32
    %67 = arith.cmpi eq, %c16_i32_27, %c0_i32_28 : i32
    %c1_i32_29 = arith.constant 1 : i32
    %68 = arith.select %67, %c1_i32_29, %c16_i32_27 : i32
    %69 = vector.broadcast %68 : i32 to vector<32x256xi32>
    %70 = arith.remsi %66, %69 : vector<32x256xi32>
    %c0_i32_30 = arith.constant 0 : i32
    %71 = vector.broadcast %c0_i32_30 : i32 to vector<32x256xi32>
    %72 = arith.cmpi ne, %70, %71 : vector<32x256xi32>
    %c0_i32_31 = arith.constant 0 : i32
    %73 = vector.broadcast %c0_i32_31 : i32 to vector<32x256xi32>
    %74 = arith.cmpi slt, %70, %73 : vector<32x256xi32>
    %c0_i32_32 = arith.constant 0 : i32
    %75 = arith.cmpi slt, %68, %c0_i32_32 : i32
    %76 = vector.broadcast %75 : i1 to vector<32x256xi1>
    %77 = vector.broadcast %76 : vector<32x256xi1> to vector<32x256xi1>
    %78 = arith.xori %74, %77 : vector<32x256xi1>
    %79 = arith.andi %78, %72 : vector<32x256xi1>
    %80 = vector.broadcast %68 : i32 to vector<32x256xi32>
    %81 = arith.addi %70, %80 : vector<32x256xi32>
    %82 = arith.select %79, %81, %70 : vector<32x256xi1>, vector<32x256xi32>
    %83 = vector.extract_strided_slice %65 {offsets = [0, 0], sizes = [32, 256], strides = [1, 1]} : vector<32x290xf32> to vector<32x256xf32>
    %c1_i32_33 = arith.constant 1 : i32
    %84 = vector.broadcast %c1_i32_33 : i32 to vector<32x256xi32>
    %85 = arith.cmpi sge, %82, %84 : vector<32x256xi32>
    %cst_34 = arith.constant 0.000000e+00 : f32
    %86 = vector.broadcast %cst_34 : f32 to vector<32x256xf32>
    %87 = arith.select %85, %83, %86 : vector<32x256xi1>, vector<32x256xf32>
    %88 = vector.extract_strided_slice %65 {offsets = [0, 1], sizes = [32, 256], strides = [1, 1]} : vector<32x290xf32> to vector<32x256xf32>
    %89 = vector.extract_strided_slice %65 {offsets = [0, 2], sizes = [32, 256], strides = [1, 1]} : vector<32x290xf32> to vector<32x256xf32>
    %c15_i32_35 = arith.constant 15 : i32
    %90 = vector.broadcast %c15_i32_35 : i32 to vector<32x256xi32>
    %91 = arith.cmpi slt, %82, %90 : vector<32x256xi32>
    %cst_36 = arith.constant 0.000000e+00 : f32
    %92 = vector.broadcast %cst_36 : f32 to vector<32x256xf32>
    %93 = arith.select %91, %89, %92 : vector<32x256xi1>, vector<32x256xf32>
    %94 = vector.extract_strided_slice %65 {offsets = [0, 16], sizes = [32, 256], strides = [1, 1]} : vector<32x290xf32> to vector<32x256xf32>
    %c1_i32_37 = arith.constant 1 : i32
    %95 = vector.broadcast %c1_i32_37 : i32 to vector<32x256xi32>
    %96 = arith.cmpi sge, %82, %95 : vector<32x256xi32>
    %cst_38 = arith.constant 0.000000e+00 : f32
    %97 = vector.broadcast %cst_38 : f32 to vector<32x256xf32>
    %98 = arith.select %96, %94, %97 : vector<32x256xi1>, vector<32x256xf32>
    %99 = vector.extract_strided_slice %65 {offsets = [0, 17], sizes = [32, 256], strides = [1, 1]} : vector<32x290xf32> to vector<32x256xf32>
    %100 = vector.extract_strided_slice %65 {offsets = [0, 18], sizes = [32, 256], strides = [1, 1]} : vector<32x290xf32> to vector<32x256xf32>
    %c15_i32_39 = arith.constant 15 : i32
    %101 = vector.broadcast %c15_i32_39 : i32 to vector<32x256xi32>
    %102 = arith.cmpi slt, %82, %101 : vector<32x256xi32>
    %cst_40 = arith.constant 0.000000e+00 : f32
    %103 = vector.broadcast %cst_40 : f32 to vector<32x256xf32>
    %104 = arith.select %102, %100, %103 : vector<32x256xi1>, vector<32x256xf32>
    %105 = vector.extract_strided_slice %65 {offsets = [0, 32], sizes = [32, 256], strides = [1, 1]} : vector<32x290xf32> to vector<32x256xf32>
    %c1_i32_41 = arith.constant 1 : i32
    %106 = vector.broadcast %c1_i32_41 : i32 to vector<32x256xi32>
    %107 = arith.cmpi sge, %82, %106 : vector<32x256xi32>
    %cst_42 = arith.constant 0.000000e+00 : f32
    %108 = vector.broadcast %cst_42 : f32 to vector<32x256xf32>
    %109 = arith.select %107, %105, %108 : vector<32x256xi1>, vector<32x256xf32>
    %110 = vector.extract_strided_slice %65 {offsets = [0, 33], sizes = [32, 256], strides = [1, 1]} : vector<32x290xf32> to vector<32x256xf32>
    %111 = vector.extract_strided_slice %65 {offsets = [0, 34], sizes = [32, 256], strides = [1, 1]} : vector<32x290xf32> to vector<32x256xf32>
    %c15_i32_43 = arith.constant 15 : i32
    %112 = vector.broadcast %c15_i32_43 : i32 to vector<32x256xi32>
    %113 = arith.cmpi slt, %82, %112 : vector<32x256xi32>
    %cst_44 = arith.constant 0.000000e+00 : f32
    %114 = vector.broadcast %cst_44 : f32 to vector<32x256xf32>
    %115 = arith.select %113, %111, %114 : vector<32x256xi1>, vector<32x256xf32>
    %116 = tpu.concatenate %87, %88, %93, %98, %99, %104, %109, %110, %115 in 0 : vector<32x256xf32>, vector<32x256xf32>, vector<32x256xf32>, vector<32x256xf32>, vector<32x256xf32>, vector<32x256xf32>, vector<32x256xf32>, vector<32x256xf32>, vector<32x256xf32> -> vector<288x256xf32>
    %cst_45 = arith.constant dense<0.000000e+00> : vector<32x256xf32>
    %117 = tpu.matmul %62, %116, %cst_45 {dimension_numbers = #tpu.dot_dimension_numbers<[1], [0], [0], [1], [0, 0, 1, 1], [], []>} : vector<32x288xf32>, vector<288x256xf32>, vector<32x256xf32> -> vector<32x256xf32>
    %118 = vector.broadcast %63 : vector<32x1xf32> to vector<32x256xf32>
    %119 = arith.addf %117, %118 : vector<32x256xf32>
    %cst_46 = arith.constant dense<0.000000e+00> : vector<32xf32>
    %120 = vector.multi_reduction <add>, %119, %cst_46 [1] : vector<32x256xf32> to vector<32xf32>
    %121 = vector.shape_cast %120 : vector<32xf32> to vector<32x1xf32>
    %cst_47 = arith.constant 2.560000e+02 : f32
    %122 = vector.broadcast %cst_47 : f32 to vector<32x1xf32>
    %123 = arith.divf %121, %122 : vector<32x1xf32>
    %c0_48 = arith.constant 0 : index
    %c0_49 = arith.constant 0 : index
    %124 = vector.load %arg6[%c0_48, %c0_49] : memref<32x2xf32, #tpu.memory_space<vmem>>, vector<32x2xf32>
    %c0_50 = arith.constant 0 : index
    %c0_51 = arith.constant 0 : index
    %125 = vector.load %arg8[%c0_50, %c0_51] : memref<32x2xf32, #tpu.memory_space<vmem>>, vector<32x2xf32>
    %c0_52 = arith.constant 0 : index
    %c0_53 = arith.constant 0 : index
    %126 = vector.load %arg7[%c0_52, %c0_53] : memref<2x1xf32, #tpu.memory_space<vmem>>, vector<2x1xf32>
    %c0_54 = arith.constant 0 : index
    %c0_55 = arith.constant 0 : index
    %127 = vector.load %arg9[%c0_54, %c0_55] : memref<32x1xf32, #tpu.memory_space<vmem>>, vector<32x1xf32>
    %128 = vector.extract_strided_slice %124 {offsets = [0, 0], sizes = [32, 1], strides = [1, 1]} : vector<32x2xf32> to vector<32x1xf32>
    %129 = arith.mulf %128, %123 : vector<32x1xf32>
    %cst_56 = arith.constant dense<0.000000e+00> : vector<1xf32>
    %130 = vector.multi_reduction <add>, %129, %cst_56 [0] : vector<32x1xf32> to vector<1xf32>
    %131 = vector.shape_cast %130 : vector<1xf32> to vector<1x1xf32>
    %132 = vector.extract_strided_slice %126 {offsets = [0, 0], sizes = [1, 1], strides = [1, 1]} : vector<2x1xf32> to vector<1x1xf32>
    %133 = arith.addf %131, %132 : vector<1x1xf32>
    %cst_57 = arith.constant 0.000000e+00 : f32
    %134 = vector.broadcast %cst_57 : f32 to vector<1x1xf32>
    %135 = arith.maximumf %133, %134 : vector<1x1xf32>
    %136 = vector.extract_strided_slice %125 {offsets = [0, 0], sizes = [32, 1], strides = [1, 1]} : vector<32x2xf32> to vector<32x1xf32>
    %137 = vector.broadcast %135 : vector<1x1xf32> to vector<32x1xf32>
    %138 = arith.mulf %136, %137 : vector<32x1xf32>
    %139 = arith.addf %127, %138 : vector<32x1xf32>
    %140 = vector.extract_strided_slice %124 {offsets = [0, 1], sizes = [32, 1], strides = [1, 1]} : vector<32x2xf32> to vector<32x1xf32>
    %141 = arith.mulf %140, %123 : vector<32x1xf32>
    %cst_58 = arith.constant dense<0.000000e+00> : vector<1xf32>
    %142 = vector.multi_reduction <add>, %141, %cst_58 [0] : vector<32x1xf32> to vector<1xf32>
    %143 = vector.shape_cast %142 : vector<1xf32> to vector<1x1xf32>
    %144 = vector.extract_strided_slice %126 {offsets = [1, 0], sizes = [1, 1], strides = [1, 1]} : vector<2x1xf32> to vector<1x1xf32>
    %145 = arith.addf %143, %144 : vector<1x1xf32>
    %cst_59 = arith.constant 0.000000e+00 : f32
    %146 = vector.broadcast %cst_59 : f32 to vector<1x1xf32>
    %147 = arith.maximumf %145, %146 : vector<1x1xf32>
    %148 = vector.extract_strided_slice %125 {offsets = [0, 1], sizes = [32, 1], strides = [1, 1]} : vector<32x2xf32> to vector<32x1xf32>
    %149 = vector.broadcast %147 : vector<1x1xf32> to vector<32x1xf32>
    %150 = arith.mulf %148, %149 : vector<32x1xf32>
    %151 = arith.addf %139, %150 : vector<32x1xf32>
    %152 = arith.negf %151 : vector<32x1xf32>
    %153 = math.exp %152 : vector<32x1xf32>
    %cst_60 = arith.constant 1.000000e+00 : f32
    %154 = vector.broadcast %cst_60 : f32 to vector<32x1xf32>
    %155 = arith.addf %154, %153 : vector<32x1xf32>
    %156 = arith.divf %154, %155 : vector<32x1xf32>
    %157 = vector.broadcast %156 : vector<32x1xf32> to vector<32x256xf32>
    %158 = arith.mulf %119, %157 : vector<32x256xf32>
    %159 = arith.addf %158, %1 : vector<32x256xf32>
    %c0_61 = arith.constant 0 : index
    %c0_62 = arith.constant 0 : index
    %c0_63 = arith.constant 0 : index
    %160 = vector.load %arg10[%c0_61, %c0_62, %c0_63] : memref<1x32x256xf32, #tpu.memory_space<vmem>>, vector<1x32x256xf32>
    %161 = vector.shape_cast %160 : vector<1x32x256xf32> to vector<32x256xf32>
    %162 = vector.shape_cast %159 : vector<32x256xf32> to vector<1x32x256xf32>
    tpu.vector_store %arg10[%c0_61, %c0_62, %c0_63], %162 {strides = array<i32>} : memref<1x32x256xf32, #tpu.memory_space<vmem>>, vector<1x32x256xf32>,
    return
  }
  func.func @transform_0(%arg0: i32) -> (i32, i32, i32) {
    %c0_i32 = arith.constant 0 : i32
    %c0_i32_0 = arith.constant 0 : i32
    %c0_i32_1 = arith.constant 0 : i32
    return %arg0, %c0_i32, %c0_i32_0 : i32, i32, i32
  }
  func.func @transform_1(%arg0: i32) -> (i32, i32) {
    %c0_i32 = arith.constant 0 : i32
    %c0_i32_0 = arith.constant 0 : i32
    %c0_i32_1 = arith.constant 0 : i32
    return %c0_i32, %c0_i32_0 : i32, i32
  }
  func.func @transform_2(%arg0: i32) -> (i32, i32) {
    %c0_i32 = arith.constant 0 : i32
    %c0_i32_0 = arith.constant 0 : i32
    %c0_i32_1 = arith.constant 0 : i32
    return %c0_i32, %c0_i32_0 : i32, i32
  }
  func.func @transform_3(%arg0: i32) -> (i32, i32) {
    %c0_i32 = arith.constant 0 : i32
    %c0_i32_0 = arith.constant 0 : i32
    %c0_i32_1 = arith.constant 0 : i32
    return %c0_i32, %c0_i32_0 : i32, i32
  }
  func.func @transform_4(%arg0: i32) -> (i32, i32) {
    %c0_i32 = arith.constant 0 : i32
    %c0_i32_0 = arith.constant 0 : i32
    %c0_i32_1 = arith.constant 0 : i32
    return %c0_i32, %c0_i32_0 : i32, i32
  }
  func.func @transform_5(%arg0: i32) -> (i32, i32) {
    %c0_i32 = arith.constant 0 : i32
    %c0_i32_0 = arith.constant 0 : i32
    %c0_i32_1 = arith.constant 0 : i32
    return %c0_i32, %c0_i32_0 : i32, i32
  }
  func.func @transform_6(%arg0: i32) -> (i32, i32) {
    %c0_i32 = arith.constant 0 : i32
    %c0_i32_0 = arith.constant 0 : i32
    %c0_i32_1 = arith.constant 0 : i32
    return %c0_i32, %c0_i32_0 : i32, i32
  }
  func.func @transform_7(%arg0: i32) -> (i32, i32) {
    %c0_i32 = arith.constant 0 : i32
    %c0_i32_0 = arith.constant 0 : i32
    %c0_i32_1 = arith.constant 0 : i32
    return %c0_i32, %c0_i32_0 : i32, i32
  }
  func.func @transform_8(%arg0: i32) -> (i32, i32) {
    %c0_i32 = arith.constant 0 : i32
    %c0_i32_0 = arith.constant 0 : i32
    %c0_i32_1 = arith.constant 0 : i32
    return %c0_i32, %c0_i32_0 : i32, i32
  }
  func.func @transform_9(%arg0: i32) -> (i32, i32, i32) {
    %c0_i32 = arith.constant 0 : i32
    %c0_i32_0 = arith.constant 0 : i32
    %c0_i32_1 = arith.constant 0 : i32
    return %arg0, %c0_i32, %c0_i32_0 : i32, i32, i32
  }
}

</mosaic_0001>

<bundles_post_ra>
// kernel: rcab_forward.1
= control target key start
LH: loop header
LB: loop body
LE: loop exit
PB: predicated region body
PF: predicated region fallthrough
CT: control target
= control target key end

     0   :  { %s2169_s30 = smov 0   ;;  %s3450_s0 = inlined_call_operand.vmem [shape: f32[2,32,256], index: 0, kind: input, shape index: {}]   ;;  %s3451_s1 = inlined_call_operand.vmem [shape: f32[32,288], index: 1, kind: input, shape index: {}]   ;;  %s3452_s2 = inlined_call_operand.vmem [shape: f32[32,1], index: 2, kind: input, shape index: {}]   ;;  %s3453_s3 = inlined_call_operand.vmem [shape: f32[32,288], index: 3, kind: input, shape index: {}]   ;;  %s3454_s4 = inlined_call_operand.vmem [shape: f32[32,1], index: 4, kind: input, shape index: {}]   ;;  %s3455_s5 = inlined_call_operand.vmem [shape: f32[32,2], index: 5, kind: input, shape index: {}]   ;;  %s3456_s6 = inlined_call_operand.vmem [shape: f32[2,1], index: 6, kind: input, shape index: {}]   ;;  %s3457_s7 = inlined_call_operand.vmem [shape: f32[32,2], index: 7, kind: input, shape index: {}]   ;;  %s3458_s8 = inlined_call_operand.vmem [shape: f32[32,1], index: 8, kind: input, shape index: {}]   ;;  %s3459_s9 = inlined_call_operand.vmem [shape: f32[2,32,256], index: 9, kind: output, shape index: {}]  }
   0x1 LB: > { %s1924_s10 = sadd.s32 4294967295, %s2105_s30   ;;  %p1928_p0 = scmp.ge.s32.totalorder %s2105_s30, 1  ;;  %s2105_s30 = sphi %s2169_s30, %s19_s30  }
   0x2   : > { %p287_p1 = scmp.lt.s32.totalorder %s2105_s30, 3 }
   0x4   : > { %p288_p2 = pnand %p1928_p0, %p287_p1 }
   0x6   : > { %291 = sbr.rel (%p288_p2) target bundleno = 1725 (0x6bd), region = 56 }
   0xb   : > { %p323_p3 = scmp.lt.s32.totalorder %s1924_s10, 1  ;;  %s2107_s15 = smov 17   ;;  %vm381_vm0 = vcmask 138240   ;;  %v3460_v28 = vlaneseq  ;;  %vm526_vm1 = vcmask 916480   ;;  %vm477_vm4 = vcmask 1031168   ;;  %v1045_v55 = vld [vmem:[%s3453_s3 + $0x28] sm:$0xff] }
   0xc   : > { %s2108_s16 = smov 112   ;;  %s2109_s17 = smov 126   ;;  %vm722_vm7 = vcmask 1039360   ;;  %vm804_vm8 = vcmask 777216   ;;  %vm624_vm9 = vcmask 785408   ;;  %vm575_vm10 = vcmask 900096  }
   0xd   : > { %s3501_s10 = smov (!%p323_p3, %s1924_s10), 1  ;;  %s2110_s18 = smov 127   ;;  %v407_v29 = vand.u32 127, %v3460_v28  ;;  %vm763_vm11 = vcmask 908288   ;;  %vm673_vm12 = vcmask 769024   ;;  %vm841_vm13 = vcmask 261120  }
   0xe   : > { %s2043_s11 = sshll.u32 %s3501_s10, 6  ;;  %s2111_s19 = smov 95   ;;  %v1048_v59 = vld [vmem:[%s3453_s3 + $0x40] sm:$0xff]  ;;  %vm1724_vm14 = vcmask 7168   ;;  %vm1752_vm15 = vcmask 15368  }
   0xf   : > { %s2185_s14 = scalar_lea.vmem %s3450_s0, %s2043_s11  ;;  %s2112_s20 = smov 96   ;;  %v408_v30 = vadd.s32 128, %v407_v29  ;;  %v413_v35 = vand.u32 15, %v407_v29 }
  0x10   : > { %v339_v0 = vld [vmem:[%s2185_s14 + $0x30] sm:$0xff]  ;;  %v337_v1 = vld [vmem:[%s2185_s14 + $0x20] sm:$0xff]  ;;  %v340_v2 = vld [vmem:[%s2185_s14 + $0x38] sm:$0xff]  ;;  %s2113_s21 = smov 110   ;;  %s2114_s22 = smov 111  }
  0x11   : > { %377 = vrot.lane.b32.xlu0 %v339_v0, %s2107_s15  ;;  %373 = vrot.lane.b32.xlu1 %v337_v1, %s2107_s15  ;;  %v338_v3 = vld [vmem:[%s2185_s14 + $0x28] sm:$0xff]  ;;  %v336_v4 = vld [vmem:[%s2185_s14 + $0x18] sm:$0xff]  ;;  %v420_v31 = vand.u32 15, %v408_v30  ;;  %vm2367_vm3 = vcmp.ge.s32.totalorder %v413_v35, 1  ;;  %vm2423_vm6 = vcmp.lt.s32.totalorder %v413_v35, 15  ;;  %s2115_s23 = smov 94   ;;  %s3423_s28 = scalar_lea.vmem %s3459_s9, %s2043_s11 }
  0x12   : > { %v335_v5 = vld [vmem:[%s2185_s14 + $0x10] sm:$0xff]  ;;  %v334_v6 = vld [vmem:[%s2185_s14 + $0x8] sm:$0xff]  ;;  %v333_v7 = vld [vmem:[%s2185_s14] sm:$0xff] }
  0x13   : > { %vm2356_vm2 = vcmp.ge.s32.totalorder %v420_v31, 1  ;;  %vm2410_vm5 = vcmp.lt.s32.totalorder %v420_v31, 15  ;;  %v342_v35 = vld [vmem:[%s3451_s1 + $0x8] sm:$0xff] }
  0x14   : > { %918 = vmatprep.mubr.f32.mxu0 %v342_v35 }
  0x15   : > { %379 = vrot.lane.b32.xlu0 %v340_v2, %s2107_s15  ;;  %375 = vrot.lane.b32.xlu1 %v338_v3, %s2107_s15 }
  0x19   : > { %371 = vrot.lane.b32.xlu1 %v336_v4, %s2107_s15  ;;  %369 = vrot.lane.b32.xlu0 %v335_v5, %s2107_s15 }
  0x1d   : > { %367 = vrot.lane.b32.xlu1 %v334_v6, %s2107_s15  ;;  %365 = vrot.lane.b32.xlu0 %v333_v7, %s2107_s15 }
  0x83   : > { %v378_v8 = vpop.permute.xlu0 %377  ;;  %v374_v9 = vpop.permute.xlu1 %373 }
  0x84   : > { %v2214_v14 = vsel %vm381_vm0, 0.0, %v378_v8  ;;  %v2224_v18 = vsel %vm381_vm0, 0.0, %v374_v9 }
  0x87   : > { %v380_v10 = vpop.permute.xlu0 %379  ;;  %v376_v13 = vpop.permute.xlu1 %375 }
  0x88   : > { %v2204_v11 = vsel %vm381_vm0, %v378_v8, %v380_v10  ;;  %v2207_v12 = vsel %vm381_vm0, %v380_v10, 0.0  ;;  %v2217_v15 = vsel %vm381_vm0, %v374_v9, %v376_v13  ;;  %v2227_v19 = vsel %vm381_vm0, %v376_v13, 0.0 }
  0x89   : > { %524 = vrot.lane.b32.xlu1 %v2207_v12, %s2108_s16  ;;  %522 = vrot.lane.b32.xlu0 %v2204_v11, %s2108_s16 }
  0x8b   : > { %v372_v16 = vpop.permute.xlu1 %371  ;;  %v370_v17 = vpop.permute.xlu0 %369 }
  0x8c   : > { %v2234_v20 = vsel %vm381_vm0, %v372_v16, 0.0  ;;  %v2237_v21 = vsel %vm381_vm0, %v370_v17, %v372_v16  ;;  %v2247_v25 = vsel %vm381_vm0, 0.0, %v370_v17 }
  0x8d   : > { %516 = vrot.lane.b32.xlu1 %v2217_v15, %s2108_s16  ;;  %520 = vrot.lane.b32.xlu0 %v2214_v14, %s2108_s16 }
  0x8f   : > { %v368_v22 = vpop.permute.xlu1 %367  ;;  %v366_v23 = vpop.permute.xlu0 %365 }
  0x90   : > { %v2244_v24 = vsel %vm381_vm0, %v366_v23, %v368_v22  ;;  %v2254_v26 = vsel %vm381_vm0, %v368_v22, 0.0  ;;  %v2257_v27 = vsel %vm381_vm0, 0.0, %v366_v23 }
  0x91   : > { %514 = vrot.lane.b32.xlu1 %v2224_v18, %s2108_s16  ;;  %518 = vrot.lane.b32.xlu0 %v2227_v19, %s2108_s16 }
  0x95   : > { %512 = vrot.lane.b32.xlu1 %v2234_v20, %s2108_s16  ;;  %510 = vrot.lane.b32.xlu0 %v2237_v21, %s2108_s16 }
  0x99   : > { %508 = vrot.lane.b32.xlu0 %v2247_v25, %s2108_s16  ;;  %504 = vrot.lane.b32.xlu1 %v2244_v24, %s2108_s16 }
  0x9d   : > { %506 = vrot.lane.b32.xlu0 %v2254_v26, %s2108_s16  ;;  %502 = vrot.lane.b32.xlu1 %v2257_v27, %s2108_s16 }
  0xa1   : > { %473 = vrot.lane.b32.xlu0 %v2204_v11, %s2109_s17  ;;  %475 = vrot.lane.b32.xlu1 %v2207_v12, %s2109_s17 }
  0xa5   : > { %471 = vrot.lane.b32.xlu0 %v2214_v14, %s2109_s17  ;;  %467 = vrot.lane.b32.xlu1 %v2217_v15, %s2109_s17 }
  0xa9   : > { %469 = vrot.lane.b32.xlu0 %v2227_v19, %s2109_s17  ;;  %465 = vrot.lane.b32.xlu1 %v2224_v18, %s2109_s17 }
  0xad   : > { %461 = vrot.lane.b32.xlu0 %v2237_v21, %s2109_s17  ;;  %463 = vrot.lane.b32.xlu1 %v2234_v20, %s2109_s17 }
  0xb1   : > { %459 = vrot.lane.b32.xlu0 %v2247_v25, %s2109_s17  ;;  %455 = vrot.lane.b32.xlu1 %v2244_v24, %s2109_s17 }
  0xb5   : > { %457 = vrot.lane.b32.xlu0 %v2254_v26, %s2109_s17  ;;  %453 = vrot.lane.b32.xlu1 %v2257_v27, %s2109_s17 }
  0xb9   : > { %718 = vrot.lane.b32.xlu0 %v2204_v11, %s2110_s18  ;;  %720 = vrot.lane.b32.xlu1 %v2207_v12, %s2110_s18 }
  0xbd   : > { %716 = vrot.lane.b32.xlu0 %v2214_v14, %s2110_s18  ;;  %712 = vrot.lane.b32.xlu1 %v2217_v15, %s2110_s18 }
  0xc1   : > { %714 = vrot.lane.b32.xlu0 %v2227_v19, %s2110_s18  ;;  %710 = vrot.lane.b32.xlu1 %v2224_v18, %s2110_s18 }
  0xc5   : > { %706 = vrot.lane.b32.xlu0 %v2237_v21, %s2110_s18  ;;  %708 = vrot.lane.b32.xlu1 %v2234_v20, %s2110_s18 }
  0xc9   : > { %704 = vrot.lane.b32.xlu0 %v2247_v25, %s2110_s18  ;;  %700 = vrot.lane.b32.xlu1 %v2244_v24, %s2110_s18 }
  0xcd   : > { %702 = vrot.lane.b32.xlu0 %v2254_v26, %s2110_s18  ;;  %698 = vrot.lane.b32.xlu1 %v2257_v27, %s2110_s18 }
  0xd1   : > { %800 = vrot.lane.b32.xlu0 %v2204_v11, %s2111_s19  ;;  %802 = vrot.lane.b32.xlu1 %v2207_v12, %s2111_s19 }
  0xd5   : > { %798 = vrot.lane.b32.xlu0 %v2214_v14, %s2111_s19  ;;  %794 = vrot.lane.b32.xlu1 %v2217_v15, %s2111_s19 }
  0xd9   : > { %796 = vrot.lane.b32.xlu0 %v2227_v19, %s2111_s19  ;;  %792 = vrot.lane.b32.xlu1 %v2224_v18, %s2111_s19 }
  0xdd   : > { %788 = vrot.lane.b32.xlu0 %v2237_v21, %s2111_s19  ;;  %790 = vrot.lane.b32.xlu1 %v2234_v20, %s2111_s19 }
  0xe1   : > { %786 = vrot.lane.b32.xlu0 %v2247_v25, %s2111_s19  ;;  %782 = vrot.lane.b32.xlu1 %v2244_v24, %s2111_s19 }
  0xe5   : > { %784 = vrot.lane.b32.xlu0 %v2254_v26, %s2111_s19  ;;  %780 = vrot.lane.b32.xlu1 %v2257_v27, %s2111_s19 }
  0xe9   : > { %620 = vrot.lane.b32.xlu0 %v2204_v11, %s2112_s20  ;;  %622 = vrot.lane.b32.xlu1 %v2207_v12, %s2112_s20 }
  0xed   : > { %618 = vrot.lane.b32.xlu0 %v2214_v14, %s2112_s20  ;;  %614 = vrot.lane.b32.xlu1 %v2217_v15, %s2112_s20 }
  0xf1   : > { %616 = vrot.lane.b32.xlu0 %v2227_v19, %s2112_s20  ;;  %612 = vrot.lane.b32.xlu1 %v2224_v18, %s2112_s20 }
  0xf5   : > { %608 = vrot.lane.b32.xlu0 %v2237_v21, %s2112_s20  ;;  %610 = vrot.lane.b32.xlu1 %v2234_v20, %s2112_s20 }
  0xf9   : > { %606 = vrot.lane.b32.xlu0 %v2247_v25, %s2112_s20  ;;  %602 = vrot.lane.b32.xlu1 %v2244_v24, %s2112_s20 }
  0xfb   : > { %v525_v32 = vpop.permute.xlu1 %524  ;;  %v523_v33 = vpop.permute.xlu0 %522 }
  0xfc   : > { %v534_v36 = vsel %vm526_vm1, %v523_v33, %v525_v32 }
  0xfd   : > { %604 = vrot.lane.b32.xlu0 %v2254_v26, %s2112_s20  ;;  %600 = vrot.lane.b32.xlu1 %v2257_v27, %s2112_s20 }
  0xfe   : > { %1933 = vmatprep.subr.msk.mxu0 %vm2356_vm2, %v534_v36 }
  0xff   : > { %v517_v37 = vpop.permute.xlu1 %516  ;;  %v521_v38 = vpop.permute.xlu0 %520 }
 0x100   : > { %v533_v40 = vsel %vm526_vm1, %v521_v38, %v523_v33 }
 0x101   : > { %571 = vrot.lane.b32.xlu0 %v2204_v11, %s2113_s21  ;;  %573 = vrot.lane.b32.xlu1 %v2207_v12, %s2113_s21 }
 0x102   : > { %1934 = vmatpush1.msk.msra.mxu0 %vm2367_vm3, %v533_v40 }
 0x103   : > { %v515_v41 = vpop.permute.xlu1 %514  ;;  %v519_v42 = vpop.permute.xlu0 %518 }
 0x104   : > { %v531_v43 = vsel %vm526_vm1, %v515_v41, %v517_v37  ;;  %v532_v44 = vsel %vm526_vm1, %v517_v37, %v519_v42  ;;  %v3461_v42 = vmov 0.0  }
 0x105   : > { %569 = vrot.lane.b32.xlu0 %v2214_v14, %s2113_s21  ;;  %565 = vrot.lane.b32.xlu1 %v2217_v15, %s2113_s21 }
 0x106   : > { %1935 = vmatprep.subr.msk.mxu0 %vm2356_vm2, %v532_v44  ;;  %1007 = vmatprep.mubr.f32.mxu1 %v3461_v42 }
 0x107   : > { %1936 = vmatpush1.msk.msra.mxu0 %vm2367_vm3, %v531_v43  ;;  %v513_v45 = vpop.permute.xlu1 %512  ;;  %v511_v46 = vpop.permute.xlu0 %510 }
 0x108   : > { %v530_v47 = vsel %vm526_vm1, %v511_v46, %v513_v45 }
 0x109   : > { %567 = vrot.lane.b32.xlu0 %v2227_v19, %s2113_s21  ;;  %563 = vrot.lane.b32.xlu1 %v2224_v18, %s2113_s21 }
 0x10a   : > { %1937 = vmatprep.subr.msk.mxu0 %vm2356_vm2, %v530_v47 }
 0x10b   : > { %v505_v48 = vpop.permute.xlu1 %504  ;;  %v509_v49 = vpop.permute.xlu0 %508 }
 0x10c   : > { %v529_v50 = vsel %vm526_vm1, %v509_v49, %v511_v46 }
 0x10d   : > { %559 = vrot.lane.b32.xlu0 %v2237_v21, %s2113_s21  ;;  %561 = vrot.lane.b32.xlu1 %v2234_v20, %s2113_s21 }
 0x10e   : > { %1938 = vmatpush1.msk.msra.mxu0 %vm2367_vm3, %v529_v50 }
 0x10f   : > { %v503_v51 = vpop.permute.xlu1 %502  ;;  %v507_v52 = vpop.permute.xlu0 %506 }
 0x110   : > { %v527_v53 = vsel %vm526_vm1, %v503_v51, %v505_v48  ;;  %v528_v54 = vsel %vm526_vm1, %v505_v48, %v507_v52 }
 0x111   : > { %557 = vrot.lane.b32.xlu0 %v2247_v25, %s2113_s21  ;;  %553 = vrot.lane.b32.xlu1 %v2244_v24, %s2113_s21 }
 0x112   : > { %1939 = vmatprep.subr.msk.mxu0 %vm2356_vm2, %v528_v54 }
 0x113   : > { %1940 = vmatpush1.msk.msra.mxu0 %vm2367_vm3, %v527_v53  ;;  %v476_v56 = vpop.permute.xlu1 %475  ;;  %v474_v57 = vpop.permute.xlu0 %473  ;;  %v354_v53 = vld [vmem:[%s3452_s2 + $0x8] sm:$0xff] }
 0x114   : > { %v485_v58 = vsel %vm477_vm4, %v474_v57, %v476_v56 }
 0x115   : > { %555 = vrot.lane.b32.xlu0 %v2254_v26, %s2113_s21  ;;  %551 = vrot.lane.b32.xlu1 %v2257_v27, %s2113_s21 }
 0x116   : > { %1941 = vmatprep.subr.msk.mxu0 %vm2410_vm5, %v485_v58 }
 0x117   : > { %v468_v60 = vpop.permute.xlu1 %467  ;;  %v472_v61 = vpop.permute.xlu0 %471 }
 0x118   : > { %v484_v62 = vsel %vm477_vm4, %v472_v61, %v474_v57 }
 0x119   : > { %759 = vrot.lane.b32.xlu0 %v2204_v11, %s2114_s22  ;;  %761 = vrot.lane.b32.xlu1 %v2207_v12, %s2114_s22 }
 0x11a   : > { %1942 = vmatpush1.msk.msra.mxu0 %vm2423_vm6, %v484_v62 }
 0x11b   : > { %v466_v63 = vpop.permute.xlu1 %465  ;;  %v470_v0 = vpop.permute.xlu0 %469 }
 0x11c   : > { %v482_v1 = vsel %vm477_vm4, %v466_v63, %v468_v60  ;;  %v483_v2 = vsel %vm477_vm4, %v468_v60, %v470_v0 }
 0x11d   : > { %757 = vrot.lane.b32.xlu0 %v2214_v14, %s2114_s22  ;;  %669 = vrot.lane.b32.xlu1 %v2204_v11, %s2115_s23 }
 0x11e   : > { %1943 = vmatprep.subr.msk.mxu0 %vm2410_vm5, %v483_v2 }
 0x11f   : > { %1944 = vmatpush1.msk.msra.mxu0 %vm2423_vm6, %v482_v1  ;;  %v464_v3 = vpop.permute.xlu1 %463  ;;  %v462_v4 = vpop.permute.xlu0 %461 }
 0x120   : > { %v481_v5 = vsel %vm477_vm4, %v462_v4, %v464_v3 }
 0x121   : > { %671 = vrot.lane.b32.xlu0 %v2207_v12, %s2115_s23  ;;  %753 = vrot.lane.b32.xlu1 %v2217_v15, %s2114_s22 }
 0x122   : > { %1945 = vmatprep.subr.msk.mxu0 %vm2410_vm5, %v481_v5 }
 0x123   : > { %v456_v6 = vpop.permute.xlu1 %455  ;;  %v460_v7 = vpop.permute.xlu0 %459 }
 0x124   : > { %v480_v8 = vsel %vm477_vm4, %v460_v7, %v462_v4 }
 0x125   : > { %755 = vrot.lane.b32.xlu0 %v2227_v19, %s2114_s22  ;;  %667 = vrot.lane.b32.xlu1 %v2214_v14, %s2115_s23 }
 0x126   : > { %1946 = vmatpush1.msk.msra.mxu0 %vm2423_vm6, %v480_v8 }
 0x127   : > { %v454_v9 = vpop.permute.xlu1 %453  ;;  %v458_v10 = vpop.permute.xlu0 %457 }
 0x128   : > { %v478_v12 = vsel %vm477_vm4, %v454_v9, %v456_v6  ;;  %v479_v13 = vsel %vm477_vm4, %v456_v6, %v458_v10 }
 0x129   : > { %751 = vrot.lane.b32.xlu0 %v2224_v18, %s2114_s22  ;;  %663 = vrot.lane.b32.xlu1 %v2217_v15, %s2115_s23 }
 0x12a   : > { %1947 = vmatprep.subr.msk.mxu0 %vm2410_vm5, %v479_v13 }
 0x12b   : > { %1948 = vmatpush1.msk.msra.mxu0 %vm2423_vm6, %v478_v12  ;;  %v721_v16 = vpop.permute.xlu1 %720  ;;  %v719_v17 = vpop.permute.xlu0 %718 }
 0x12c   : > { %v730_v22 = vsel %vm722_vm7, %v719_v17, %v721_v16 }
 0x12d   : > { %665 = vrot.lane.b32.xlu0 %v2227_v19, %s2115_s23  ;;  %747 = vrot.lane.b32.xlu1 %v2237_v21, %s2114_s22 }
 0x12e   : > { %870 = vmatprep.subr.mxu0 %v730_v22 }
 0x12f   : > { %v713_v23 = vpop.permute.xlu1 %712  ;;  %v717_v29 = vpop.permute.xlu0 %716 }
 0x130   : > { %v729_v30 = vsel %vm722_vm7, %v717_v29, %v719_v17 }
 0x131   : > { %749 = vrot.lane.b32.xlu0 %v2234_v20, %s2114_s22  ;;  %661 = vrot.lane.b32.xlu1 %v2224_v18, %s2115_s23 }
 0x132   : > { %871 = vmatpush1.msra.mxu0 %v729_v30 }
 0x133   : > { %v711_v31 = vpop.permute.xlu1 %710  ;;  %v715_v32 = vpop.permute.xlu0 %714 }
 0x134   : > { %v728_v33 = vsel %vm722_vm7, %v713_v23, %v715_v32  ;;  %v727_v19 = vsel %vm722_vm7, %v711_v31, %v713_v23 }
 0x135   : > { %745 = vrot.lane.b32.xlu0 %v2247_v25, %s2114_s22  ;;  %657 = vrot.lane.b32.xlu1 %v2237_v21, %s2115_s23 }
 0x136   : > { %872 = vmatprep.subr.mxu0 %v728_v33 }
 0x137   : > { %873 = vmatpush1.msra.mxu0 %v727_v19  ;;  %v709_v36 = vpop.permute.xlu1 %708  ;;  %v707_v37 = vpop.permute.xlu0 %706 }
 0x138   : > { %v726_v38 = vsel %vm722_vm7, %v707_v37, %v709_v36 }
 0x139   : > { %659 = vrot.lane.b32.xlu0 %v2234_v20, %s2115_s23  ;;  %741 = vrot.lane.b32.xlu1 %v2244_v24, %s2114_s22 }
 0x13a   : > { %874 = vmatprep.subr.mxu0 %v726_v38 }
 0x13b   : > { %v701_v40 = vpop.permute.xlu1 %700  ;;  %v705_v41 = vpop.permute.xlu0 %704 }
 0x13c   : > { %v725_v43 = vsel %vm722_vm7, %v705_v41, %v707_v37 }
 0x13d   : > { %743 = vrot.lane.b32.xlu0 %v2254_v26, %s2114_s22  ;;  %655 = vrot.lane.b32.xlu1 %v2247_v25, %s2115_s23 }
 0x13e   : > { %875 = vmatpush1.msra.mxu0 %v725_v43 }
 0x13f   : > { %v699_v44 = vpop.permute.xlu1 %698  ;;  %v703_v20 = vpop.permute.xlu0 %702 }
 0x140   : > { %v724_v45 = vsel %vm722_vm7, %v701_v40, %v703_v20  ;;  %v723_v46 = vsel %vm722_vm7, %v699_v44, %v701_v40 }
 0x141   : > { %739 = vrot.lane.b32.xlu0 %v2257_v27, %s2114_s22  ;;  %651 = vrot.lane.b32.xlu1 %v2244_v24, %s2115_s23 }
 0x142   : > { %876 = vmatprep.subr.mxu0 %v724_v45 }
 0x143   : > { %877 = vmatpush1.msra.mxu0 %v723_v46  ;;  %v803_v47 = vpop.permute.xlu1 %802  ;;  %v801_v48 = vpop.permute.xlu0 %800 }
 0x144   : > { %1949 = vmatprep.subr.msk.mxu0 %vm2356_vm2, %v2204_v11  ;;  %v812_v50 = vsel %vm804_vm8, %v801_v48, %v803_v47 }
 0x145   : > { %1950 = vmatpush1.msk.msra.mxu0 %vm2367_vm3, %v2214_v14  ;;  %653 = vrot.lane.b32.xlu0 %v2254_v26, %s2115_s23  ;;  %v356_v14 = vld [vmem:[%s3452_s2 + $0x18] sm:$0xff]  ;;  %v2117_v26 = vmov 0  }
 0x146   : > { %649 = vrot.lane.b32.xlu1 %v2257_v27, %s2115_s23  ;;  %1951 = vmatprep.subr.msk.mxu0 %vm2356_vm2, %v2217_v15  ;;  %v355_v15 = vld [vmem:[%s3452_s2 + $0x10] sm:$0xff] }
 0x147   : > { %1952 = vmatpush1.msk.msra.mxu0 %vm2367_vm3, %v2224_v18  ;;  %v795_v49 = vpop.permute.xlu1 %794  ;;  %v799_v11 = vpop.permute.xlu0 %798  ;;  %2073 = vset.pattern.permute.xlu0 %v2117_v26  ;;  %v353_v18 = vld [vmem:[%s3452_s2] sm:$0xff] }
 0x148   : > { %1953 = vmatprep.subr.msk.mxu0 %vm2356_vm2, %v2237_v21  ;;  %2074 = vset.pattern.permute.xlu1 %v2117_v26 }
 0x149   : > { %1954 = vmatpush1.msk.msra.mxu0 %vm2367_vm3, %v2247_v25  ;;  %838 = vperm.xlu0 %2073, %v356_v14   ;;  %v811_v25 = vsel %vm804_vm8, %v799_v11, %v801_v48 }
 0x14a   : > { %1955 = vmatprep.subr.msk.mxu0 %vm2356_vm2, %v2244_v24  ;;  %833 = vperm.xlu1 %2074, %v355_v15  }
 0x14b   : > { %1956 = vmatpush1.msk.msra.mxu0 %vm2367_vm3, %v2257_v27  ;;  %v793_v21 = vpop.permute.xlu1 %792  ;;  %v797_v51 = vpop.permute.xlu0 %796 }
 0x14c   : > { %886 = vmatprep.subr.mxu0 %v812_v50  ;;  %v810_v52 = vsel %vm804_vm8, %v795_v49, %v797_v51  ;;  %v809_v24 = vsel %vm804_vm8, %v793_v21, %v795_v49 }
 0x14d   : > { %887 = vmatpush2.msra.mxu0 %v811_v25  ;;  %823 = vperm.xlu0 %2073, %v353_v18  }
 0x14e   : > { %888 = vmatprep.subr.mxu0 %v810_v52  ;;  %828 = vperm.xlu1 %2074, %v354_v53  }
 0x14f   : > { %889 = vmatpush2.msra.mxu0 %v809_v24  ;;  %v791_v27 = vpop.permute.xlu1 %790  ;;  %v789_v54 = vpop.permute.xlu0 %788 }
 0x150   : > { %v808_v56 = vsel %vm804_vm8, %v789_v54, %v791_v27 }
 0x151   : > { %890 = vmatprep.subr.mxu0 %v808_v56 }
 0x153   : > { %v783_v57 = vpop.permute.xlu1 %782  ;;  %v787_v58 = vpop.permute.xlu0 %786 }
 0x154   : > { %v807_v60 = vsel %vm804_vm8, %v787_v58, %v789_v54 }
 0x155   : > { %891 = vmatpush2.msra.mxu0 %v807_v60 }
 0x157   : > { %v781_v61 = vpop.permute.xlu1 %780  ;;  %v785_v62 = vpop.permute.xlu0 %784 }
 0x158   : > { %v806_v63 = vsel %vm804_vm8, %v783_v57, %v785_v62  ;;  %v805_v0 = vsel %vm804_vm8, %v781_v61, %v783_v57 }
 0x159   : > { %892 = vmatprep.subr.mxu0 %v806_v63 }
 0x15a   : > { %893 = vmatpush2.msra.mxu0 %v805_v0 }
 0x15b   : > { %v623_v1 = vpop.permute.xlu1 %622  ;;  %v621_v2 = vpop.permute.xlu0 %620 }
 0x15c   : > { %v632_v3 = vsel %vm624_vm9, %v621_v2, %v623_v1 }
 0x15d   : > { %1957 = vmatprep.subr.msk.mxu0 %vm2356_vm2, %v632_v3 }
 0x15f   : > { %v615_v4 = vpop.permute.xlu1 %614  ;;  %v619_v5 = vpop.permute.xlu0 %618 }
 0x160   : > { %v631_v6 = vsel %vm624_vm9, %v619_v5, %v621_v2 }
 0x161   : > { %1958 = vmatpush2.msk.msra.mxu0 %vm2367_vm3, %v631_v6 }
 0x163   : > { %v613_v7 = vpop.permute.xlu1 %612  ;;  %v617_v8 = vpop.permute.xlu0 %616 }
 0x164   : > { %v629_v9 = vsel %vm624_vm9, %v613_v7, %v615_v4  ;;  %v630_v10 = vsel %vm624_vm9, %v615_v4, %v617_v8 }
 0x165   : > { %1959 = vmatprep.subr.msk.mxu0 %vm2356_vm2, %v630_v10 }
 0x166   : > { %1960 = vmatpush2.msk.msra.mxu0 %vm2367_vm3, %v629_v9 }
 0x167   : > { %v611_v12 = vpop.permute.xlu1 %610  ;;  %v609_v13 = vpop.permute.xlu0 %608 }
 0x168   : > { %v628_v16 = vsel %vm624_vm9, %v609_v13, %v611_v12 }
 0x169   : > { %1961 = vmatprep.subr.msk.mxu0 %vm2356_vm2, %v628_v16 }
 0x16b   : > { %v603_v17 = vpop.permute.xlu1 %602  ;;  %v607_v22 = vpop.permute.xlu0 %606 }
 0x16c   : > { %v627_v23 = vsel %vm624_vm9, %v607_v22, %v609_v13 }
 0x16d   : > { %1962 = vmatpush2.msk.msra.mxu0 %vm2367_vm3, %v627_v23 }
 0x16f   : > { %v601_v29 = vpop.permute.xlu1 %600  ;;  %v605_v30 = vpop.permute.xlu0 %604 }
 0x170   : > { %v625_v31 = vsel %vm624_vm9, %v601_v29, %v603_v17  ;;  %v626_v32 = vsel %vm624_vm9, %v603_v17, %v605_v30  ;;  %v341_v30 = vld [vmem:[%s3451_s1] sm:$0xff] }
 0x171   : > { %1963 = vmatprep.subr.msk.mxu0 %vm2356_vm2, %v626_v32  ;;  %v345_v32 = vld [vmem:[%s3451_s1 + $0x20] sm:$0xff] }
 0x172   : > { %1964 = vmatpush2.msk.msra.mxu0 %vm2367_vm3, %v625_v31 }
 0x173   : > { %v574_v33 = vpop.permute.xlu1 %573  ;;  %v572_v19 = vpop.permute.xlu0 %571 }
 0x174   : > { %v583_v35 = vsel %vm575_vm10, %v572_v19, %v574_v33 }
 0x175   : > { %1965 = vmatprep.subr.msk.mxu0 %vm2410_vm5, %v583_v35 }
 0x177   : > { %v566_v36 = vpop.permute.xlu1 %565  ;;  %v570_v37 = vpop.permute.xlu0 %569 }
 0x178   : > { %v582_v38 = vsel %vm575_vm10, %v570_v37, %v572_v19  ;;  %v344_v19 = vld [vmem:[%s3451_s1 + $0x18] sm:$0xff]  ;;  %v343_v37 = vld [vmem:[%s3451_s1 + $0x10] sm:$0xff] }
 0x179   : > { %1966 = vmatpush2.msk.msra.mxu0 %vm2423_vm6, %v582_v38  ;;  %v348_v38 = vld [vmem:[%s3451_s1 + $0x38] sm:$0xff] }
 0x17b   : > { %v564_v40 = vpop.permute.xlu1 %563  ;;  %v568_v41 = vpop.permute.xlu0 %567 }
 0x17c   : > { %v580_v43 = vsel %vm575_vm10, %v564_v40, %v566_v36  ;;  %v581_v44 = vsel %vm575_vm10, %v566_v36, %v568_v41  ;;  %v347_v41 = vld [vmem:[%s3451_s1 + $0x30] sm:$0xff] }
 0x17d   : > { %1967 = vmatprep.subr.msk.mxu0 %vm2410_vm5, %v581_v44  ;;  %v351_v44 = vld [vmem:[%s3451_s1 + $0x50] sm:$0xff] }
 0x17e   : > { %1968 = vmatpush2.msk.msra.mxu0 %vm2423_vm6, %v580_v43  ;;  %v346_v43 = vld [vmem:[%s3451_s1 + $0x28] sm:$0xff] }
 0x17f   : > { %v562_v20 = vpop.permute.xlu1 %561  ;;  %v560_v45 = vpop.permute.xlu0 %559 }
 0x180   : > { %v579_v46 = vsel %vm575_vm10, %v560_v45, %v562_v20  ;;  %v350_v20 = vld [vmem:[%s3451_s1 + $0x48] sm:$0xff] }
 0x181   : > { %1969 = vmatprep.subr.msk.mxu0 %vm2410_vm5, %v579_v46  ;;  %v352_v46 = vld [vmem:[%s3451_s1 + $0x58] sm:$0xff] }
 0x183   : > { %v554_v47 = vpop.permute.xlu1 %553  ;;  %v558_v48 = vpop.permute.xlu0 %557 }
 0x184   : > { %v578_v49 = vsel %vm575_vm10, %v558_v48, %v560_v45  ;;  %v349_v45 = vld [vmem:[%s3451_s1 + $0x40] sm:$0xff] }
 0x185   : > { %1970 = vmatpush2.msk.msra.mxu0 %vm2423_vm6, %v578_v49 }
 0x187   : > { %v552_v11 = vpop.permute.xlu1 %551  ;;  %v556_v14 = vpop.permute.xlu0 %555 }
 0x188   : > { %v576_v26 = vsel %vm575_vm10, %v552_v11, %v554_v47  ;;  %v577_v15 = vsel %vm575_vm10, %v554_v47, %v556_v14 }
 0x189   : > { %1971 = vmatprep.subr.msk.mxu0 %vm2410_vm5, %v577_v15 }
 0x18a   : > { %1972 = vmatpush2.msk.msra.mxu0 %vm2423_vm6, %v576_v26 }
 0x18b   : > { %v762_v18 = vpop.permute.xlu1 %761  ;;  %v760_v21 = vpop.permute.xlu0 %759 }
 0x18c   : > { %v771_v50 = vsel %vm763_vm11, %v760_v21, %v762_v18 }
 0x18d   : > { %910 = vmatprep.subr.mxu0 %v771_v50 }
 0x18f   : > { %v670_v51 = vpop.permute.xlu1 %669  ;;  %v758_v25 = vpop.permute.xlu0 %757 }
 0x190   : > { %v770_v52 = vsel %vm763_vm11, %v758_v25, %v760_v21 }
 0x191   : > { %911 = vmatpush2.msra.mxu0 %v770_v52 }
 0x193   : > { %v754_v24 = vpop.permute.xlu1 %753  ;;  %v672_v53 = vpop.permute.xlu0 %671 }
 0x194   : > { %v681_v27 = vsel %vm673_vm12, %v670_v51, %v672_v53 }
 0x195   : > { %1973 = vmatprep.subr.msk.mxu1 %vm2410_vm5, %v681_v27 }
 0x197   : > { %v668_v54 = vpop.permute.xlu1 %667  ;;  %v756_v56 = vpop.permute.xlu0 %755 }
 0x198   : > { %v769_v57 = vsel %vm763_vm11, %v754_v24, %v756_v56  ;;  %v680_v58 = vsel %vm673_vm12, %v668_v54, %v670_v51 }
 0x199   : > { %912 = vmatprep.subr.mxu0 %v769_v57  ;;  %1974 = vmatpush1.msk.msra.mxu1 %vm2423_vm6, %v680_v58 }
 0x19b   : > { %v664_v60 = vpop.permute.xlu1 %663  ;;  %v752_v61 = vpop.permute.xlu0 %751 }
 0x19c   : > { %v768_v62 = vsel %vm763_vm11, %v752_v61, %v754_v24 }
 0x19d   : > { %913 = vmatpush2.msra.mxu0 %v768_v62 }
 0x19f   : > { %v748_v63 = vpop.permute.xlu1 %747  ;;  %v666_v0 = vpop.permute.xlu0 %665 }
 0x1a0   : > { %v679_v1 = vsel %vm673_vm12, %v664_v60, %v666_v0 }
 0x1a1   : > { %1975 = vmatprep.subr.msk.mxu1 %vm2410_vm5, %v679_v1 }
 0x1a3   : > { %v662_v2 = vpop.permute.xlu1 %661  ;;  %v750_v3 = vpop.permute.xlu0 %749 }
 0x1a4   : > { %v678_v4 = vsel %vm673_vm12, %v662_v2, %v664_v60  ;;  %v767_v5 = vsel %vm763_vm11, %v748_v63, %v750_v3 }
 0x1a5   : > { %914 = vmatprep.subr.mxu0 %v767_v5  ;;  %1976 = vmatpush1.msk.msra.mxu1 %vm2423_vm6, %v678_v4 }
 0x1a7   : > { %v658_v6 = vpop.permute.xlu1 %657  ;;  %v746_v7 = vpop.permute.xlu0 %745 }
 0x1a8   : > { %v766_v8 = vsel %vm763_vm11, %v746_v7, %v748_v63 }
 0x1a9   : > { %915 = vmatpush2.msra.mxu0 %v766_v8 }
 0x1ab   : > { %v742_v9 = vpop.permute.xlu1 %741  ;;  %v660_v10 = vpop.permute.xlu0 %659 }
 0x1ac   : > { %v677_v12 = vsel %vm673_vm12, %v658_v6, %v660_v10 }
 0x1ad   : > { %1977 = vmatprep.subr.msk.mxu1 %vm2410_vm5, %v677_v12 }
 0x1af   : > { %v656_v13 = vpop.permute.xlu1 %655  ;;  %v744_v16 = vpop.permute.xlu0 %743 }
 0x1b0   : > { %v676_v17 = vsel %vm673_vm12, %v656_v13, %v658_v6  ;;  %v765_v22 = vsel %vm763_vm11, %v742_v9, %v744_v16 }
 0x1b1   : > { %916 = vmatprep.subr.mxu0 %v765_v22  ;;  %1978 = vmatpush1.msk.msra.mxu1 %vm2423_vm6, %v676_v17 }
 0x1b3   : > { %v652_v23 = vpop.permute.xlu1 %651  ;;  %v740_v29 = vpop.permute.xlu0 %739 }
 0x1b4   : > { %v764_v31 = vsel %vm763_vm11, %v740_v29, %v742_v9 }
 0x1b5   : > { %917 = vmatpush2.msra.mxu0 %v764_v31 }
 0x1b6   : > { %919 = vmatmul.mubr.f32.vlgmr.msra.gmra.mxu0 %v341_v30 }
 0x1b7   : > { %v654_v33 = vpop.permute.xlu0 %653  ;;  %924 = vmatprep.mubr.f32.mxu0 %v345_v32 }
 0x1b8   : > { %v650_v35 = vpop.permute.xlu1 %649  ;;  %v675_v36 = vsel %vm673_vm12, %v652_v23, %v654_v33 }
 0x1b9   : > { %v674_v40 = vsel %vm673_vm12, %v650_v35, %v652_v23  ;;  %1979 = vmatprep.subr.msk.mxu1 %vm2410_vm5, %v675_v36 }
 0x1ba   : > { %925 = vmatmul.mubr.f32.gmra.mxu0 %v344_v19  ;;  %1980 = vmatpush1.msk.msra.mxu1 %vm2423_vm6, %v674_v40 }
 0x1bb   : > { %1981 = vmatmul.mubr.msk.f32.vlgmr.msra.gmra.mxu1 %vm841_vm13, %v343_v37  ;;  %930 = vmatprep.mubr.f32.mxu0 %v348_v38 }
 0x1bc   : > { %1013 = vmatprep.mubr.f32.mxu1 %v3461_v42 }
 0x1be   : > { %931 = vmatmul.mubr.f32.gmra.mxu0 %v347_v41 }
 0x1bf   : > { %1982 = vmatmul.mubr.msk.f32.gmra.mxu1 %vm841_vm13, %v346_v43  ;;  %936 = vmatprep.mubr.f32.mxu0 %v351_v44 }
 0x1c0   : > { %1019 = vmatprep.mubr.f32.mxu1 %v3461_v42 }
 0x1c2   : > { %937 = vmatmul.mubr.f32.gmra.mxu0 %v350_v20 }
 0x1c3   : > { %1983 = vmatmul.mubr.msk.f32.gmra.mxu1 %vm841_vm13, %v349_v45  ;;  %1665 = vmatprep.mubr.f32.mxu0 %v3461_v42 }
 0x1c4   : > { %1025 = vmatprep.mubr.f32.mxu1 %v3461_v42  ;;  %v839_v47 = vpop.permute.xlu0 %838 }
 0x1c5   : > { %v834_v48 = vpop.permute.xlu1 %833 }
 0x1c7   : > { %1984 = vmatmul.mubr.msk.f32.gmra.mxu1 %vm841_vm13, %v352_v46 }
 0x1c8   : > { %v824_v11 = vpop.permute.xlu0 %823 }
 0x1c9   : > { %v829_v26 = vpop.permute.xlu1 %828 }
 0x276   : > { %v920_v49 = vpop.f32.mrf.mxu0 }
 0x277   : > { %v921_v18 = vadd.f32 %v920_v49, %v824_v11 }
 0x278   : > { %v922_v14 = vpop.f32.mrf.mxu0 }
 0x279   : > { %v923_v50 = vadd.f32 %v922_v14, %v824_v11 }
 0x27a   : > { %v926_v15 = vpop.f32.mrf.mxu0 }
 0x27b   : > { %v1009_v21 = vpop.f32.mrf.mxu1  ;;  %v927_v52 = vadd.f32 %v926_v15, %v829_v26 }
 0x27c   : > { %v1010_v51 = vadd.f32 %v1009_v21, %v921_v18  ;;  %v928_v25 = vpop.f32.mrf.mxu0 }
 0x27d   : > { %v1011_v24 = vpop.f32.mrf.mxu1  ;;  %v929_v56 = vadd.f32 %v928_v25, %v829_v26 }
 0x27e   : > { %v1032_v53 = vmax.f32 %v1010_v51, 0.0  ;;  %v1012_v27 = vadd.f32 %v1011_v24, %v923_v50  ;;  %v932_v54 = vpop.f32.mrf.mxu0 }
 0x27f   : > { %v1015_v57 = vpop.f32.mrf.mxu1  ;;  %v933_v60 = vadd.f32 %v932_v54, %v834_v48 }
 0x280   : > { %v1033_v58 = vmax.f32 %v1012_v27, 0.0  ;;  %v1016_v61 = vadd.f32 %v1015_v57, %v927_v52  ;;  %v934_v62 = vpop.f32.mrf.mxu0  ;;  %1064 = vrot.lane.b32.xlu1 %v1032_v53, %s2107_s15 }
 0x281   : > { %v1017_v63 = vpop.f32.mrf.mxu1  ;;  %v935_v1 = vadd.f32 %v934_v62, %v834_v48 }
 0x282   : > { %v1034_v0 = vmax.f32 %v1016_v61, 0.0  ;;  %v1018_v2 = vadd.f32 %v1017_v63, %v929_v56  ;;  %v938_v3 = vpop.f32.mrf.mxu0  ;;  %1066 = vrot.lane.b32.xlu0 %v1033_v58, %s2107_s15 }
 0x283   : > { %v1021_v4 = vpop.f32.mrf.mxu1  ;;  %v939_v9 = vadd.f32 %v938_v3, %v839_v47 }
 0x284   : > { %v1035_v5 = vmax.f32 %v1018_v2, 0.0  ;;  %v1022_v6 = vadd.f32 %v1021_v4, %v933_v60  ;;  %1068 = vrot.lane.b32.xlu1 %v1034_v0, %s2107_s15  ;;  %v940_v7 = vpop.f32.mrf.mxu0 }
 0x285   : > { %v1023_v8 = vpop.f32.mrf.mxu1  ;;  %v941_v16 = vadd.f32 %v940_v7, %v839_v47 }
 0x286   : > { %v1036_v10 = vmax.f32 %v1022_v6, 0.0  ;;  %v1024_v12 = vadd.f32 %v1023_v8, %v935_v1  ;;  %1070 = vrot.lane.b32.xlu0 %v1035_v5, %s2107_s15 }
 0x287   : > { %v1027_v13 = vpop.f32.mrf.mxu1 }
 0x288   : > { %v1037_v17 = vmax.f32 %v1024_v12, 0.0  ;;  %v1028_v22 = vadd.f32 %v1027_v13, %v939_v9  ;;  %1072 = vrot.lane.b32.xlu1 %v1036_v10, %s2107_s15 }
 0x289   : > { %v1029_v23 = vpop.f32.mrf.mxu1 }
 0x28a   : > { %v1038_v29 = vmax.f32 %v1028_v22, 0.0  ;;  %v1030_v30 = vadd.f32 %v1029_v23, %v941_v16  ;;  %1074 = vrot.lane.b32.xlu0 %v1037_v17, %s2107_s15  ;;  %v1041_v23 = vld [vmem:[%s3453_s3 + $0x8] sm:$0xff] }
 0x28b   : > { %1576 = vmatprep.mubr.f32.mxu1 %v1041_v23 }
 0x28c   : > { %v1039_v31 = vmax.f32 %v1030_v30, 0.0  ;;  %1076 = vrot.lane.b32.xlu1 %v1038_v29, %s2107_s15 }
 0x28e   : > { %1078 = vrot.lane.b32.xlu0 %v1039_v31, %s2107_s15 }
 0x2f2   : > { %v1065_v32 = vpop.permute.xlu1 %1064 }
 0x2f3   : > { %v2682_v33 = vsel %vm381_vm0, 0.0, %v1065_v32 }
 0x2f4   : > { %v1067_v19 = vpop.permute.xlu0 %1066  ;;  %1168 = vrot.lane.b32.xlu0 %v2682_v33, %s2108_s16 }
 0x2f5   : > { %v2687_v35 = vsel %vm381_vm0, %v1067_v19, 0.0  ;;  %v2708_v36 = vsel %vm381_vm0, %v1065_v32, %v1067_v19 }
 0x2f6   : > { %1172 = vrot.lane.b32.xlu1 %v2687_v35, %s2108_s16  ;;  %v1069_v37 = vpop.permute.xlu1 %1068 }
 0x2f7   : > { %v2717_v38 = vsel %vm381_vm0, 0.0, %v1069_v37 }
 0x2f8   : > { %1120 = vrot.lane.b32.xlu0 %v2682_v33, %s2109_s17  ;;  %v1071_v40 = vpop.permute.xlu0 %1070 }
 0x2f9   : > { %v2738_v41 = vsel %vm381_vm0, %v1071_v40, 0.0  ;;  %v2747_v43 = vsel %vm381_vm0, %v1069_v37, %v1071_v40 }
 0x2fa   : > { %1124 = vrot.lane.b32.xlu1 %v2687_v35, %s2109_s17  ;;  %v1073_v44 = vpop.permute.xlu1 %1072 }
 0x2fb   : > { %v2768_v20 = vsel %vm381_vm0, 0.0, %v1073_v44 }
 0x2fc   : > { %1360 = vrot.lane.b32.xlu0 %v2682_v33, %s2110_s18  ;;  %v1075_v45 = vpop.permute.xlu0 %1074 }
 0x2fd   : > { %v2777_v46 = vsel %vm381_vm0, %v1075_v45, 0.0  ;;  %v2798_v47 = vsel %vm381_vm0, %v1073_v44, %v1075_v45 }
 0x2fe   : > { %1364 = vrot.lane.b32.xlu1 %v2687_v35, %s2110_s18  ;;  %v1077_v48 = vpop.permute.xlu1 %1076 }
 0x2ff   : > { %v2807_v49 = vsel %vm381_vm0, 0.0, %v1077_v48 }
 0x300   : > { %1440 = vrot.lane.b32.xlu0 %v2682_v33, %s2111_s19  ;;  %v1079_v11 = vpop.permute.xlu0 %1078 }
 0x301   : > { %v2830_v26 = vsel %vm381_vm0, %v1079_v11, 0.0  ;;  %v2845_v50 = vsel %vm381_vm0, %v1077_v48, %v1079_v11 }
 0x302   : > { %1444 = vrot.lane.b32.xlu1 %v2687_v35, %s2111_s19 }
 0x304   : > { %1264 = vrot.lane.b32.xlu0 %v2682_v33, %s2112_s20 }
 0x306   : > { %1268 = vrot.lane.b32.xlu1 %v2687_v35, %s2112_s20 }
 0x308   : > { %1170 = vrot.lane.b32.xlu0 %v2708_v36, %s2108_s16 }
 0x30a   : > { %1220 = vrot.lane.b32.xlu1 %v2687_v35, %s2113_s21 }
 0x30c   : > { %1122 = vrot.lane.b32.xlu0 %v2708_v36, %s2109_s17 }
 0x30e   : > { %1174 = vrot.lane.b32.xlu1 %v2717_v38, %s2108_s16 }
 0x310   : > { %1362 = vrot.lane.b32.xlu0 %v2708_v36, %s2110_s18 }
 0x312   : > { %1126 = vrot.lane.b32.xlu1 %v2717_v38, %s2109_s17 }
 0x314   : > { %1442 = vrot.lane.b32.xlu0 %v2708_v36, %s2111_s19 }
 0x316   : > { %1366 = vrot.lane.b32.xlu1 %v2717_v38, %s2110_s18 }
 0x318   : > { %1266 = vrot.lane.b32.xlu0 %v2708_v36, %s2112_s20 }
 0x31a   : > { %1446 = vrot.lane.b32.xlu1 %v2717_v38, %s2111_s19 }
 0x31c   : > { %1218 = vrot.lane.b32.xlu0 %v2708_v36, %s2113_s21 }
 0x31e   : > { %1270 = vrot.lane.b32.xlu1 %v2717_v38, %s2112_s20 }
 0x320   : > { %1178 = vrot.lane.b32.xlu0 %v2738_v41, %s2108_s16 }
 0x322   : > { %1222 = vrot.lane.b32.xlu1 %v2717_v38, %s2113_s21 }
 0x324   : > { %1130 = vrot.lane.b32.xlu0 %v2738_v41, %s2109_s17 }
 0x326   : > { %1176 = vrot.lane.b32.xlu1 %v2747_v43, %s2108_s16 }
 0x328   : > { %1370 = vrot.lane.b32.xlu0 %v2738_v41, %s2110_s18 }
 0x32a   : > { %1128 = vrot.lane.b32.xlu1 %v2747_v43, %s2109_s17 }
 0x32c   : > { %1450 = vrot.lane.b32.xlu0 %v2738_v41, %s2111_s19 }
 0x32e   : > { %1368 = vrot.lane.b32.xlu1 %v2747_v43, %s2110_s18 }
 0x330   : > { %1274 = vrot.lane.b32.xlu0 %v2738_v41, %s2112_s20 }
 0x332   : > { %1448 = vrot.lane.b32.xlu1 %v2747_v43, %s2111_s19 }
 0x334   : > { %1226 = vrot.lane.b32.xlu0 %v2738_v41, %s2113_s21 }
 0x336   : > { %1272 = vrot.lane.b32.xlu1 %v2747_v43, %s2112_s20 }
 0x338   : > { %1180 = vrot.lane.b32.xlu0 %v2768_v20, %s2108_s16 }
 0x33a   : > { %1224 = vrot.lane.b32.xlu1 %v2747_v43, %s2113_s21 }
 0x33c   : > { %1132 = vrot.lane.b32.xlu0 %v2768_v20, %s2109_s17 }
 0x33e   : > { %1184 = vrot.lane.b32.xlu1 %v2777_v46, %s2108_s16 }
 0x340   : > { %1372 = vrot.lane.b32.xlu0 %v2768_v20, %s2110_s18 }
 0x342   : > { %1136 = vrot.lane.b32.xlu1 %v2777_v46, %s2109_s17 }
 0x344   : > { %1452 = vrot.lane.b32.xlu0 %v2768_v20, %s2111_s19 }
 0x346   : > { %1376 = vrot.lane.b32.xlu1 %v2777_v46, %s2110_s18 }
 0x348   : > { %1276 = vrot.lane.b32.xlu0 %v2768_v20, %s2112_s20 }
 0x34a   : > { %1456 = vrot.lane.b32.xlu1 %v2777_v46, %s2111_s19 }
 0x34c   : > { %1228 = vrot.lane.b32.xlu0 %v2768_v20, %s2113_s21 }
 0x34e   : > { %1280 = vrot.lane.b32.xlu1 %v2777_v46, %s2112_s20 }
 0x350   : > { %1182 = vrot.lane.b32.xlu0 %v2798_v47, %s2108_s16 }
 0x352   : > { %1232 = vrot.lane.b32.xlu1 %v2777_v46, %s2113_s21 }
 0x354   : > { %1134 = vrot.lane.b32.xlu0 %v2798_v47, %s2109_s17 }
 0x356   : > { %1186 = vrot.lane.b32.xlu1 %v2807_v49, %s2108_s16 }
 0x358   : > { %1374 = vrot.lane.b32.xlu0 %v2798_v47, %s2110_s18 }
 0x35a   : > { %1138 = vrot.lane.b32.xlu1 %v2807_v49, %s2109_s17 }
 0x35c   : > { %1454 = vrot.lane.b32.xlu0 %v2798_v47, %s2111_s19 }
 0x35e   : > { %1378 = vrot.lane.b32.xlu1 %v2807_v49, %s2110_s18 }
 0x360   : > { %1278 = vrot.lane.b32.xlu0 %v2798_v47, %s2112_s20 }
 0x362   : > { %1458 = vrot.lane.b32.xlu1 %v2807_v49, %s2111_s19 }
 0x364   : > { %1230 = vrot.lane.b32.xlu0 %v2798_v47, %s2113_s21 }
 0x366   : > { %v2825_v14 = vpop.permute.xlu0 %1168  ;;  %1282 = vrot.lane.b32.xlu1 %v2807_v49, %s2112_s20 }
 0x368   : > { %1190 = vrot.lane.b32.xlu0 %v2830_v26, %s2108_s16  ;;  %v2834_v15 = vpop.permute.xlu1 %1172 }
 0x36a   : > { %v2836_v18 = vpop.permute.xlu0 %1120  ;;  %1234 = vrot.lane.b32.xlu1 %v2807_v49, %s2113_s21 }
 0x36c   : > { %1216 = vrot.lane.b32.xlu0 %v2682_v33, %s2113_s21  ;;  %v2842_v21 = vpop.permute.xlu1 %1124 }
 0x36e   : > { %v2847_v51 = vpop.permute.xlu0 %1360  ;;  %1188 = vrot.lane.b32.xlu1 %v2845_v50, %s2108_s16 }
 0x370   : > { %1142 = vrot.lane.b32.xlu0 %v2830_v26, %s2109_s17  ;;  %v2853_v25 = vpop.permute.xlu1 %1364 }
 0x372   : > { %v2855_v52 = vpop.permute.xlu0 %1440  ;;  %1418 = vrot.lane.b32.xlu1 %v2807_v49, %s2114_s22 }
 0x374   : > { %1414 = vrot.lane.b32.xlu0 %v2798_v47, %s2114_s22  ;;  %v2861_v24 = vpop.permute.xlu1 %1444 }
 0x376   : > { %v2863_v53 = vpop.permute.xlu0 %1264  ;;  %1140 = vrot.lane.b32.xlu1 %v2845_v50, %s2109_s17  ;;  %s2118_s17 = smov 1  }
 0x377   : > { %3474 = vst [vmem:[#allocation2_spill] sm:$0xff] %v2863_v53 }
 0x378   : > { %1382 = vrot.lane.b32.xlu0 %v2830_v26, %s2110_s18  ;;  %v2869_v27 = vpop.permute.xlu1 %1268 }
 0x379   : > { %3475 = vst [vmem:[#allocation3_spill] sm:$0xff] %v2869_v27 }
 0x37a   : > { %v2871_v54 = vpop.permute.xlu0 %1170  ;;  %1416 = vrot.lane.b32.xlu1 %v2777_v46, %s2114_s22 }
 0x37c   : > { %1412 = vrot.lane.b32.xlu0 %v2768_v20, %s2114_s22  ;;  %v2877_v56 = vpop.permute.xlu1 %1220 }
 0x37d   : > { %3476 = vst [vmem:[#allocation4_spill] sm:$0xff] %v2877_v56 }
 0x37e   : > { %v2879_v57 = vpop.permute.xlu0 %1122  ;;  %1380 = vrot.lane.b32.xlu1 %v2845_v50, %s2110_s18 }
 0x380   : > { %1410 = vrot.lane.b32.xlu0 %v2738_v41, %s2114_s22  ;;  %v2885_v58 = vpop.permute.xlu1 %1174 }
 0x382   : > { %v2887_v60 = vpop.permute.xlu0 %1362  ;;  %1408 = vrot.lane.b32.xlu1 %v2747_v43, %s2114_s22 }
 0x384   : > { %1402 = vrot.lane.b32.xlu0 %v2708_v36, %s2114_s22  ;;  %v2893_v61 = vpop.permute.xlu1 %1126 }
 0x386   : > { %v2895_v62 = vpop.permute.xlu0 %1442  ;;  %1406 = vrot.lane.b32.xlu1 %v2717_v38, %s2114_s22 }
 0x388   : > { %1462 = vrot.lane.b32.xlu0 %v2830_v26, %s2111_s19  ;;  %v1367_v63 = vpop.permute.xlu1 %1366 }
 0x38a   : > { %v2901_v0 = vpop.permute.xlu0 %1266  ;;  %1404 = vrot.lane.b32.xlu1 %v2687_v35, %s2114_s22 }
 0x38b   : > { %3477 = vst [vmem:[#allocation5_spill] sm:$0xff] %v2901_v0 }
 0x38c   : > { %1330 = vrot.lane.b32.xlu0 %v2807_v49, %s2115_s23  ;;  %v1447_v1 = vpop.permute.xlu1 %1446 }
 0x38e   : > { %v2907_v2 = vpop.permute.xlu0 %1218  ;;  %1460 = vrot.lane.b32.xlu1 %v2845_v50, %s2111_s19 }
 0x38f   : > { %3478 = vst [vmem:[#allocation6_spill] sm:$0xff] %v2907_v2 }
 0x390   : > { %1286 = vrot.lane.b32.xlu0 %v2830_v26, %s2112_s20  ;;  %v1271_v3 = vpop.permute.xlu1 %1270 }
 0x392   : > { %v1179_v4 = vpop.permute.xlu0 %1178  ;;  %1400 = vrot.lane.b32.xlu1 %v2682_v33, %s2114_s22 }
 0x394   : > { %1326 = vrot.lane.b32.xlu0 %v2798_v47, %s2115_s23  ;;  %v1223_v5 = vpop.permute.xlu1 %1222 }
 0x396   : > { %v1131_v6 = vpop.permute.xlu0 %1130  ;;  %1284 = vrot.lane.b32.xlu1 %v2845_v50, %s2112_s20 }
 0x398   : > { %1238 = vrot.lane.b32.xlu0 %v2830_v26, %s2113_s21  ;;  %v2921_v7 = vpop.permute.xlu1 %1176 }
 0x399   : > { %v2925_v8 = vsel %vm526_vm1, %v2921_v7, %v1179_v4 }
 0x39a   : > { %v1371_v9 = vpop.permute.xlu0 %1370  ;;  %1328 = vrot.lane.b32.xlu1 %v2777_v46, %s2115_s23 }
 0x39c   : > { %1324 = vrot.lane.b32.xlu0 %v2768_v20, %s2115_s23  ;;  %v2931_v10 = vpop.permute.xlu1 %1128 }
 0x39d   : > { %v2935_v12 = vsel %vm477_vm4, %v2931_v10, %v1131_v6 }
 0x39e   : > { %v1451_v13 = vpop.permute.xlu0 %1450  ;;  %1236 = vrot.lane.b32.xlu1 %v2845_v50, %s2113_s21 }
 0x3a0   : > { %1422 = vrot.lane.b32.xlu0 %v2830_v26, %s2114_s22  ;;  %v1369_v16 = vpop.permute.xlu1 %1368 }
 0x3a1   : > { %v2942_v17 = vsel %vm722_vm7, %v1367_v63, %v1369_v16  ;;  %v2945_v22 = vsel %vm722_vm7, %v1369_v16, %v1371_v9  ;;  %v1054_v9 = vld [vmem:[%s3454_s4 + $0x10] sm:$0xff] }
 0x3a2   : > { %v1275_v29 = vpop.permute.xlu0 %1274  ;;  %1320 = vrot.lane.b32.xlu1 %v2747_v43, %s2115_s23 }
 0x3a4   : > { %1322 = vrot.lane.b32.xlu0 %v2738_v41, %s2115_s23  ;;  %v1449_v30 = vpop.permute.xlu1 %1448 }
 0x3a5   : > { %v2955_v31 = vsel %vm804_vm8, %v1447_v1, %v1449_v30  ;;  %v2958_v32 = vsel %vm804_vm8, %v1449_v30, %v1451_v13 }
 0x3a6   : > { %v1227_v19 = vpop.permute.xlu0 %1226  ;;  %1420 = vrot.lane.b32.xlu1 %v2845_v50, %s2114_s22 }
 0x3a8   : > { %1332 = vrot.lane.b32.xlu0 %v2845_v50, %s2115_s23  ;;  %v1273_v37 = vpop.permute.xlu1 %1272 }
 0x3a9   : > { %v2965_v40 = vsel %vm624_vm9, %v1271_v3, %v1273_v37  ;;  %v2968_v41 = vsel %vm624_vm9, %v1273_v37, %v1275_v29  ;;  %v1052_v3 = vld [vmem:[%s3454_s4] sm:$0xff] }
 0x3aa   : > { %3479 = vst [vmem:[#allocation7_spill] sm:$0xff] %v2965_v40  ;;  %v1181_v44 = vpop.permute.xlu0 %1180  ;;  %1334 = vrot.lane.b32.xlu1 %v2830_v26, %s2115_s23  ;;  %v1053_v26 = vld [vmem:[%s3454_s4 + $0x8] sm:$0xff] }
 0x3ac   : > { %1314 = vrot.lane.b32.xlu0 %v2708_v36, %s2115_s23  ;;  %v1225_v45 = vpop.permute.xlu1 %1224 }
 0x3ad   : > { %v2975_v46 = vsel %vm575_vm10, %v1223_v5, %v1225_v45  ;;  %v2978_v48 = vsel %vm575_vm10, %v1225_v45, %v1227_v19  ;;  %v1055_v5 = vld [vmem:[%s3454_s4 + $0x18] sm:$0xff] }
 0x3ae   : > { %3480 = vst [vmem:[#allocation8_spill] sm:$0xff] %v2975_v46  ;;  %3481 = vst [vmem:[#allocation9_spill] sm:$0xff] %v2978_v48  ;;  %v2980_v11 = vpop.permute.xlu0 %1132  ;;  %1318 = vrot.lane.b32.xlu1 %v2717_v38, %s2115_s23 }
 0x3b0   : > { %1312 = vrot.lane.b32.xlu0 %v2682_v33, %s2115_s23  ;;  %v1185_v63 = vpop.permute.xlu1 %1184 }
 0x3b2   : > { %v2989_v1 = vpop.permute.xlu0 %1372  ;;  %1316 = vrot.lane.b32.xlu1 %v2687_v35, %s2115_s23 }
 0x3b4   : > { %1487 = vperm.xlu0 %2073, %v1053_v26   ;;  %v1137_v4 = vpop.permute.xlu1 %1136 }
 0x3b6   : > { %v2999_v6 = vpop.permute.xlu0 %1452  ;;  %1482 = vperm.xlu1 %2074, %v1052_v3  }
 0x3b8   : > { %1497 = vperm.xlu0 %2073, %v1055_v5   ;;  %v3004_v13 = vpop.permute.xlu1 %1376 }
 0x3ba   : > { %v3006_v35 = vpop.permute.xlu0 %1276  ;;  %1492 = vperm.xlu1 %2074, %v1054_v9  }
 0x3bc   : > { %v3008_v16 = vpop.permute.xlu1 %1456 }
 0x3be   : > { %v3010_v23 = vpop.permute.xlu0 %1228 }
 0x3bf   : > { %3482 = vst [vmem:[#allocation10_spill] sm:$0xff] %v3010_v23 }
 0x3c0   : > { %v3012_v29 = vpop.permute.xlu1 %1280 }
 0x3c2   : > { %v1183_v30 = vpop.permute.xlu0 %1182 }
 0x3c3   : > { %v1197_v27 = vsel %vm526_vm1, %v1183_v30, %v1185_v63 }
 0x3c4   : > { %v3014_v19 = vpop.permute.xlu1 %1232 }
 0x3c5   : > { %3483 = vst [vmem:[#allocation11_spill] sm:$0xff] %v3014_v19 }
 0x3c6   : > { %v1135_v37 = vpop.permute.xlu0 %1134  ;;  %v3492_v34 = vld [vmem:[#allocation10_spill] sm:$0xff] }
 0x3c8   : > { %v1187_v45 = vpop.permute.xlu1 %1186 }
 0x3ca   : > { %v1375_v26 = vpop.permute.xlu0 %1374 }
 0x3cc   : > { %v1139_v3 = vpop.permute.xlu1 %1138 }
 0x3ce   : > { %v3016_v28 = vpop.permute.xlu0 %1454 }
 0x3d0   : > { %v1379_v5 = vpop.permute.xlu1 %1378 }
 0x3d2   : > { %v3018_v42 = vpop.permute.xlu0 %1278 }
 0x3d4   : > { %v3020_v46 = vpop.permute.xlu1 %1458 }
 0x3d6   : > { %v3022_v9 = vpop.permute.xlu0 %1230 }
 0x3d7   : > { %3484 = vst [vmem:[#allocation12_spill] sm:$0xff] %v3022_v9  ;;  %v1196_v9 = vsel %vm526_vm1, %v1181_v44, %v1183_v30 }
 0x3d8   : > { %v3024_v2 = vpop.permute.xlu1 %1282 }
 0x3da   : > { %v1191_v56 = vpop.permute.xlu0 %1190 }
 0x3dc   : > { %v3026_v48 = vpop.permute.xlu1 %1234 }
 0x3de   : > { %v3028_v23 = vpop.permute.xlu0 %1216 }
 0x3df   : > { %3485 = vst [vmem:[#allocation13_spill] sm:$0xff] %v3028_v23 }
 0x3e0   : > { %v1189_v19 = vpop.permute.xlu1 %1188 }
 0x3e1   : > { %v1198_v53 = vsel %vm526_vm1, %v1187_v45, %v1189_v19  ;;  %v1199_v40 = vsel %vm526_vm1, %v1189_v19, %v1191_v56  ;;  %v1194_v56 = vsel %vm526_vm1, %v2885_v58, %v2921_v7 }
 0x3e2   : > { %v1143_v0 = vpop.permute.xlu0 %1142  ;;  %1985 = vmatprep.subr.msk.mxu1 %vm2356_vm2, %v1199_v40 }
 0x3e3   : > { %1986 = vmatpush1.msk.msra.mxu1 %vm2367_vm3, %v1198_v53  ;;  %v1193_v53 = vsel %vm526_vm1, %v2871_v54, %v2834_v15  ;;  %v1149_v15 = vsel %vm477_vm4, %v1135_v37, %v1137_v4  ;;  %v1144_v4 = vsel %vm477_vm4, %v2836_v18, %v2879_v57  ;;  %v1388_v18 = vsel %vm722_vm7, %v2989_v1, %v1375_v26 }
 0x3e4   : > { %1987 = vmatprep.subr.msk.mxu1 %vm2356_vm2, %v1197_v27  ;;  %v3040_v23 = vpop.permute.xlu1 %1418  ;;  %v1192_v27 = vsel %vm526_vm1, %v2825_v14, %v2871_v54  ;;  %v1148_v14 = vsel %vm477_vm4, %v2980_v11, %v1135_v37  ;;  %v1145_v11 = vsel %vm477_vm4, %v2879_v57, %v2842_v21  ;;  %v1389_v21 = vsel %vm722_vm7, %v1375_v26, %v3004_v13 }
 0x3e5   : > { %1988 = vmatpush1.msk.msra.mxu1 %vm2367_vm3, %v1196_v9  ;;  %v1385_v37 = vsel %vm722_vm7, %v2887_v60, %v2853_v25  ;;  %v1384_v13 = vsel %vm722_vm7, %v2847_v51, %v2887_v60  ;;  %v3490_v9 = vld [vmem:[#allocation11_spill] sm:$0xff] }
 0x3e6   : > { %v3047_v40 = vpop.permute.xlu0 %1414  ;;  %1989 = vmatprep.subr.msk.mxu1 %vm2356_vm2, %v2925_v8 }
 0x3e7   : > { %1990 = vmatpush1.msk.msra.mxu1 %vm2367_vm3, %v1194_v56  ;;  %v3491_v56 = vld [vmem:[#allocation12_spill] sm:$0xff] }
 0x3e8   : > { %1991 = vmatprep.subr.msk.mxu1 %vm2356_vm2, %v1193_v53  ;;  %v1141_v58 = vpop.permute.xlu1 %1140  ;;  %v1245_v53 = vsel %vm575_vm10, %v3491_v56, %v3490_v9 }
 0x3e9   : > { %v1150_v7 = vsel %vm477_vm4, %v1139_v3, %v1141_v58  ;;  %v1151_v44 = vsel %vm477_vm4, %v1141_v58, %v1143_v0  ;;  %1992 = vmatpush1.msk.msra.mxu1 %vm2367_vm3, %v1192_v27  ;;  %v1146_v0 = vsel %vm477_vm4, %v2893_v61, %v2931_v10  ;;  %v3493_v58 = vld [vmem:[#allocation9_spill] sm:$0xff] }
 0x3ea   : > { %v1383_v8 = vpop.permute.xlu0 %1382  ;;  %1993 = vmatprep.subr.msk.mxu1 %vm2410_vm5, %v1151_v44  ;;  %v3495_v44 = vld [vmem:[#allocation6_spill] sm:$0xff] }
 0x3eb   : > { %1994 = vmatpush1.msk.msra.mxu1 %vm2423_vm6, %v1150_v7  ;;  %v3494_v7 = vld [vmem:[#allocation4_spill] sm:$0xff] }
 0x3ec   : > { %1995 = vmatprep.subr.msk.mxu1 %vm2410_vm5, %v1149_v15  ;;  %v3075_v54 = vpop.permute.xlu1 %1416  ;;  %v3496_v15 = vld [vmem:[#allocation8_spill] sm:$0xff] }
 0x3ed   : > { %1996 = vmatpush1.msk.msra.mxu1 %vm2423_vm6, %v1148_v14  ;;  %v3497_v14 = vld [vmem:[#allocation13_spill] sm:$0xff] }
 0x3ee   : > { %v3082_v63 = vpop.permute.xlu0 %1412  ;;  %1997 = vmatprep.subr.msk.mxu1 %vm2410_vm5, %v2935_v12 }
 0x3ef   : > { %1998 = vmatpush1.msk.msra.mxu1 %vm2423_vm6, %v1146_v0  ;;  %v1240_v0 = vsel %vm575_vm10, %v3497_v14, %v3495_v44 }
 0x3f0   : > { %1999 = vmatprep.subr.msk.mxu1 %vm2410_vm5, %v1145_v11  ;;  %v1381_v61 = vpop.permute.xlu1 %1380 }
 0x3f1   : > { %v1390_v10 = vsel %vm722_vm7, %v1379_v5, %v1381_v61  ;;  %2000 = vmatpush1.msk.msra.mxu1 %vm2423_vm6, %v1144_v4  ;;  %v1391_v12 = vsel %vm722_vm7, %v1381_v61, %v1383_v8  ;;  %v1241_v8 = vsel %vm575_vm10, %v3495_v44, %v3494_v7 }
 0x3f2   : > { %v3101_v30 = vpop.permute.xlu0 %1410  ;;  %1528 = vmatprep.subr.mxu1 %v1391_v12  ;;  %v1429_v12 = vsel %vm763_vm11, %v3047_v40, %v3075_v54 }
 0x3f3   : > { %1529 = vmatpush1.msra.mxu1 %v1390_v10 }
 0x3f4   : > { %1530 = vmatprep.subr.mxu1 %v1389_v21  ;;  %v3107_v57 = vpop.permute.xlu1 %1408  ;;  %v1428_v21 = vsel %vm763_vm11, %v3082_v63, %v3047_v40 }
 0x3f5   : > { %1531 = vmatpush1.msra.mxu1 %v1388_v18 }
 0x3f6   : > { %v3109_v19 = vpop.permute.xlu0 %1402  ;;  %1532 = vmatprep.subr.mxu1 %v2945_v22 }
 0x3f7   : > { %1533 = vmatpush1.msra.mxu1 %v2942_v17  ;;  %v1464_v17 = vsel %vm804_vm8, %v2855_v52, %v2895_v62  ;;  %v1292_v52 = vsel %vm624_vm9, %v3006_v35, %v3018_v42 }
 0x3f8   : > { %1534 = vmatprep.subr.mxu1 %v1385_v37  ;;  %v3119_v1 = vpop.permute.xlu1 %1406  ;;  %v1427_v37 = vsel %vm763_vm11, %v3107_v57, %v3101_v30  ;;  %v1040_v30 = vld [vmem:[%s3453_s3] sm:$0xff] }
 0x3f9   : > { %1535 = vmatpush1.msra.mxu1 %v1384_v13  ;;  %v1426_v13 = vsel %vm763_vm11, %v3119_v1, %v3107_v57 }
 0x3fa   : > { %v1463_v45 = vpop.permute.xlu0 %1462  ;;  %2001 = vmatprep.subr.msk.mxu1 %vm2356_vm2, %v2845_v50 }
 0x3fb   : > { %2002 = vmatpush1.msk.msra.mxu1 %vm2367_vm3, %v2807_v49 }
 0x3fc   : > { %2003 = vmatprep.subr.msk.mxu1 %vm2356_vm2, %v2798_v47  ;;  %v3130_v25 = vpop.permute.xlu1 %1404 }
 0x3fd   : > { %2004 = vmatpush1.msk.msra.mxu1 %vm2367_vm3, %v2768_v20  ;;  %v1425_v63 = vsel %vm763_vm11, %v3109_v19, %v3130_v25 }
 0x3fe   : > { %v3135_v51 = vpop.permute.xlu0 %1330  ;;  %2005 = vmatprep.subr.msk.mxu1 %vm2356_vm2, %v2747_v43 }
 0x3ff   : > { %2006 = vmatpush1.msk.msra.mxu1 %vm2367_vm3, %v2717_v38  ;;  %v1469_v38 = vsel %vm804_vm8, %v3016_v28, %v3008_v16 }
 0x400   : > { %2007 = vmatprep.subr.msk.mxu1 %vm2356_vm2, %v2708_v36  ;;  %v1461_v47 = vpop.permute.xlu1 %1460  ;;  %v1468_v36 = vsel %vm804_vm8, %v2999_v6, %v3016_v28 }
 0x401   : > { %v1470_v49 = vsel %vm804_vm8, %v3020_v46, %v1461_v47  ;;  %2008 = vmatpush1.msk.msra.mxu1 %vm2367_vm3, %v2682_v33  ;;  %v1471_v20 = vsel %vm804_vm8, %v1461_v47, %v1463_v45  ;;  %v1465_v33 = vsel %vm804_vm8, %v2895_v62, %v2861_v24  ;;  %v1293_v24 = vsel %vm624_vm9, %v3018_v42, %v3012_v29  ;;  %v3488_v29 = vld [vmem:[#allocation7_spill] sm:$0xff]  ;;  %v3489_v42 = vld [vmem:[#allocation2_spill] sm:$0xff] }
 0x402   : > { %v1287_v50 = vpop.permute.xlu0 %1286  ;;  %1544 = vmatprep.subr.mxu1 %v1471_v20 }
 0x403   : > { %1545 = vmatpush2.msra.mxu1 %v1470_v49  ;;  %v1043_v49 = vld [vmem:[%s3453_s3 + $0x18] sm:$0xff] }
 0x404   : > { %1546 = vmatprep.subr.mxu1 %v1469_v38  ;;  %v3158_v43 = vpop.permute.xlu1 %1400 }
 0x405   : > { %1547 = vmatpush2.msra.mxu1 %v1468_v36  ;;  %v1424_v57 = vsel %vm763_vm11, %v3158_v43, %v3109_v19  ;;  %v1044_v19 = vld [vmem:[%s3453_s3 + $0x20] sm:$0xff]  ;;  %v1042_v36 = vld [vmem:[%s3453_s3 + $0x10] sm:$0xff]  ;;  %v1047_v43 = vld [vmem:[%s3453_s3 + $0x38] sm:$0xff] }
 0x406   : > { %v3160_v60 = vpop.permute.xlu0 %1326  ;;  %1548 = vmatprep.subr.mxu1 %v2958_v32  ;;  %v3487_v32 = vld [vmem:[#allocation5_spill] sm:$0xff] }
 0x407   : > { %1549 = vmatpush2.msra.mxu1 %v2955_v31  ;;  %v3486_v31 = vld [vmem:[#allocation3_spill] sm:$0xff]  ;;  %v1288_v35 = vsel %vm624_vm9, %v3489_v42, %v3487_v32 }
 0x408   : > { %1550 = vmatprep.subr.mxu1 %v1465_v33  ;;  %v1285_v28 = vpop.permute.xlu1 %1284  ;;  %v1289_v16 = vsel %vm624_vm9, %v3487_v32, %v3486_v31  ;;  %v1046_v33 = vld [vmem:[%s3453_s3 + $0x30] sm:$0xff] }
 0x409   : > { %v1294_v22 = vsel %vm624_vm9, %v3024_v2, %v1285_v28  ;;  %v1295_v46 = vsel %vm624_vm9, %v1285_v28, %v1287_v50  ;;  %1551 = vmatpush2.msra.mxu1 %v1464_v17  ;;  %v1050_v17 = vld [vmem:[%s3453_s3 + $0x50] sm:$0xff]  ;;  %v3498_v28 = vmov 0.0  }
 0x40a   : > { %v1239_v6 = vpop.permute.xlu0 %1238  ;;  %2009 = vmatprep.subr.msk.mxu1 %vm2356_vm2, %v1295_v46  ;;  %v1051_v46 = vld [vmem:[%s3453_s3 + $0x58] sm:$0xff] }
 0x40b   : > { %2010 = vmatpush2.msk.msra.mxu1 %vm2367_vm3, %v1294_v22  ;;  %v1049_v22 = vld [vmem:[%s3453_s3 + $0x48] sm:$0xff] }
 0x40c   : > { %2011 = vmatprep.subr.msk.mxu1 %vm2356_vm2, %v1293_v24  ;;  %v1329_v62 = vpop.permute.xlu1 %1328 }
 0x40d   : > { %2012 = vmatpush2.msk.msra.mxu1 %vm2367_vm3, %v1292_v52  ;;  %v1341_v40 = vsel %vm673_vm12, %v3160_v60, %v1329_v62 }
 0x40e   : > { %v1325_v2 = vpop.permute.xlu0 %1324  ;;  %2013 = vmatprep.subr.msk.mxu1 %vm2356_vm2, %v2968_v41 }
 0x40f   : > { %2014 = vmatpush2.msk.msra.mxu1 %vm2367_vm3, %v3488_v29  ;;  %v1340_v1 = vsel %vm673_vm12, %v1325_v2, %v3160_v60 }
 0x410   : > { %2015 = vmatprep.subr.msk.mxu1 %vm2356_vm2, %v1289_v16  ;;  %v1237_v26 = vpop.permute.xlu1 %1236 }
 0x411   : > { %v1246_v3 = vsel %vm575_vm10, %v3026_v48, %v1237_v26  ;;  %v1247_v41 = vsel %vm575_vm10, %v1237_v26, %v1239_v6  ;;  %2016 = vmatpush2.msk.msra.mxu1 %vm2367_vm3, %v1288_v35  ;;  %v1244_v48 = vsel %vm575_vm10, %v3492_v34, %v3491_v56 }
 0x412   : > { %v1423_v5 = vpop.permute.xlu0 %1422  ;;  %2017 = vmatprep.subr.msk.mxu1 %vm2410_vm5, %v1247_v41 }
 0x413   : > { %2018 = vmatpush2.msk.msra.mxu1 %vm2423_vm6, %v1246_v3 }
 0x414   : > { %2019 = vmatprep.subr.msk.mxu1 %vm2410_vm5, %v1245_v53  ;;  %v1321_v39 = vpop.permute.xlu1 %1320 }
 0x415   : > { %2020 = vmatpush2.msk.msra.mxu1 %vm2423_vm6, %v1244_v48 }
 0x416   : > { %v1323_v27 = vpop.permute.xlu0 %1322  ;;  %2021 = vmatprep.subr.msk.mxu1 %vm2410_vm5, %v3493_v58 }
 0x417   : > { %2022 = vmatpush2.msk.msra.mxu1 %vm2423_vm6, %v3496_v15  ;;  %v1339_v25 = vsel %vm673_vm12, %v1321_v39, %v1323_v27 }
 0x418   : > { %2023 = vmatprep.subr.msk.mxu1 %vm2410_vm5, %v1241_v8  ;;  %v1421_v11 = vpop.permute.xlu1 %1420 }
 0x419   : > { %v1430_v4 = vsel %vm763_vm11, %v3040_v23, %v1421_v11  ;;  %2024 = vmatpush2.msk.msra.mxu1 %vm2423_vm6, %v1240_v0  ;;  %v1431_v61 = vsel %vm763_vm11, %v1421_v11, %v1423_v5 }
 0x41a   : > { %v1333_v10 = vpop.permute.xlu0 %1332  ;;  %1568 = vmatprep.subr.mxu1 %v1431_v61 }
 0x41b   : > { %1569 = vmatpush2.msra.mxu1 %v1430_v4  ;;  %v1342_v54 = vsel %vm673_vm12, %v3135_v51, %v1333_v10 }
 0x41c   : > { %1570 = vmatprep.subr.mxu1 %v1429_v12  ;;  %v1335_v18 = vpop.permute.xlu1 %1334 }
 0x41d   : > { %v1343_v23 = vsel %vm673_vm12, %v1333_v10, %v1335_v18  ;;  %1571 = vmatpush2.msra.mxu1 %v1428_v21 }
 0x41e   : > { %v1315_v45 = vpop.permute.xlu0 %1314  ;;  %1572 = vmatprep.subr.mxu1 %v1427_v37  ;;  %2025 = vmatprep.subr.msk.mxu0 %vm2410_vm5, %v1343_v23 }
 0x41f   : > { %1573 = vmatpush2.msra.mxu1 %v1426_v13  ;;  %2026 = vmatpush1.msk.msra.mxu0 %vm2423_vm6, %v1342_v54 }
 0x420   : > { %1574 = vmatprep.subr.mxu1 %v1425_v63  ;;  %2027 = vmatprep.subr.msk.mxu0 %vm2410_vm5, %v1341_v40  ;;  %v1319_v51 = vpop.permute.xlu1 %1318 }
 0x421   : > { %v1338_v47 = vsel %vm673_vm12, %v1319_v51, %v1321_v39  ;;  %1575 = vmatpush2.msra.mxu1 %v1424_v57  ;;  %2028 = vmatpush1.msk.msra.mxu0 %vm2423_vm6, %v1340_v1  ;;  %v1707_v57 = vld [vmem:[%s3455_s5] sm:$0xff] }
 0x422   : > { %1577 = vmatmul.mubr.f32.vlgmr.msra.gmra.mxu1 %v1040_v30  ;;  %2045 = vmatprep.subr.msk.mxu1 %vm2410_vm5, %v1343_v23  ;;  %v1313_v20 = vpop.permute.xlu0 %1312 }
 0x423   : > { %2029 = vmatprep.subr.msk.mxu0 %vm2410_vm5, %v1339_v25  ;;  %2049 = vmatpush1.msk.msra.mxu1 %vm2423_vm6, %v1342_v54  ;;  %v1336_v60 = vsel %vm673_vm12, %v1313_v20, %v1315_v45 }
 0x424   : > { %2030 = vmatpush1.msk.msra.mxu0 %vm2423_vm6, %v1338_v47  ;;  %2046 = vmatprep.subr.msk.mxu1 %vm2410_vm5, %v1341_v40  ;;  %v1317_v50 = vpop.permute.xlu1 %1316 }
 0x425   : > { %v1337_v38 = vsel %vm673_vm12, %v1315_v45, %v1317_v50  ;;  %1582 = vmatprep.mubr.f32.mxu1 %v1044_v19  ;;  %2050 = vmatpush1.msk.msra.mxu1 %vm2423_vm6, %v1340_v1  ;;  %v1715_v45 = vld [vmem:[%s3456_s6] sm:$0x3]  ;;  %v1708_v1 = vld [vmem:[%s3455_s5 + $0x8] sm:$0xff] }
 0x426   : > { %1583 = vmatmul.mubr.f32.gmra.mxu1 %v1043_v49  ;;  %2047 = vmatprep.subr.msk.mxu1 %vm2410_vm5, %v1339_v25  ;;  %v1767_v40 = vrot.slane %v1715_v45, 1  ;;  %v1709_v49 = vld [vmem:[%s3455_s5 + $0x10] sm:$0xff] }
 0x427   : > { %2031 = vmatprep.subr.msk.mxu0 %vm2410_vm5, %v1337_v38  ;;  %2051 = vmatpush1.msk.msra.mxu1 %vm2423_vm6, %v1338_v47 }
 0x428   : > { %2032 = vmatpush1.msk.msra.mxu0 %vm2423_vm6, %v1336_v60  ;;  %2048 = vmatprep.subr.msk.mxu1 %vm2410_vm5, %v1337_v38 }
 0x429   : > { %2033 = vmatmul.mubr.msk.f32.vlgmr.msra.gmra.mxu0 %vm841_vm13, %v1042_v36  ;;  %1588 = vmatprep.mubr.f32.mxu1 %v1047_v43 }
 0x42a   : > { %2052 = vmatpush1.msk.msra.mxu1 %vm2423_vm6, %v1336_v60  ;;  %1671 = vmatprep.mubr.f32.mxu0 %v3498_v28 }
 0x42b   : > { %1589 = vmatmul.mubr.f32.gmra.mxu1 %v1046_v33  ;;  %v1710_v33 = vld [vmem:[%s3455_s5 + $0x18] sm:$0xff] }
 0x42c   : > { %1594 = vmatprep.mubr.f32.mxu1 %v1050_v17 }
 0x42d   : > { %2034 = vmatmul.mubr.msk.f32.gmra.mxu0 %vm841_vm13, %v1045_v55 }
 0x42e   : > { %1677 = vmatprep.mubr.f32.mxu0 %v3498_v28 }
 0x42f   : > { %1595 = vmatmul.mubr.f32.gmra.mxu1 %v1049_v22  ;;  %v1488_v35 = vpop.permute.xlu0 %1487 }
 0x430   : > { %1683 = vmatprep.mubr.f32.mxu1 %v3498_v28 }
 0x431   : > { %2035 = vmatmul.mubr.msk.f32.gmra.mxu0 %vm841_vm13, %v1048_v59  ;;  %v1483_v2 = vpop.permute.xlu1 %1482 }
 0x433   : > { %2036 = vmatmul.mubr.msk.f32.vlgmr.msra.gmra.mxu1 %vm841_vm13, %v1051_v46  ;;  %v1498_v8 = vpop.permute.xlu0 %1497 }
 0x435   : > { %v1493_v39 = vpop.permute.xlu1 %1492 }
 0x4e2   : > { %v1578_v6 = vpop.f32.mrf.mxu1 }
 0x4e3   : > { %v1579_v32 = vadd.f32 %v1578_v6, %v1483_v2 }
 0x4e4   : > { %v1580_v24 = vpop.f32.mrf.mxu1 }
 0x4e5   : > { %v1581_v16 = vadd.f32 %v1580_v24, %v1483_v2 }
 0x4e6   : > { %v1584_v52 = vpop.f32.mrf.mxu1 }
 0x4e7   : > { %v1585_v9 = vadd.f32 %v1584_v52, %v1488_v35 }
 0x4e8   : > { %v1586_v62 = vpop.f32.mrf.mxu1 }
 0x4e9   : > { %v1667_v31 = vpop.f32.mrf.mxu0  ;;  %v1587_v56 = vadd.f32 %v1586_v62, %v1488_v35 }
 0x4ea   : > { %v3340_v26 = vadd.f32 %v1667_v31, %v1579_v32 }
 0x4eb   : > { %v1590_v29 = vpop.f32.mrf.mxu1  ;;  %v1669_v42 = vpop.f32.mrf.mxu0 }
 0x4ec   : > { %v3342_v3 = vadd.f32 %v1669_v42, %v1581_v16  ;;  %v1591_v15 = vadd.f32 %v1590_v29, %v1493_v39 }
 0x4ed   : > { %v1592_v41 = vpop.f32.mrf.mxu1  ;;  %v1673_v5 = vpop.f32.mrf.mxu0 }
 0x4ee   : > { %v1690_v53 = vadd.f32 %v3342_v3, %v3340_v26  ;;  %v3346_v27 = vadd.f32 %v1673_v5, %v1585_v9  ;;  %v1593_v14 = vadd.f32 %v1592_v41, %v1493_v39 }
 0x4ef   : > { %v1596_v34 = vpop.f32.mrf.mxu1  ;;  %v1675_v48 = vpop.f32.mrf.mxu0 }
 0x4f0   : > { %v3348_v58 = vadd.f32 %v1675_v48, %v1587_v56  ;;  %1691 = vadd.xlane.f32.xlu1 %v1690_v53  ;;  %v1597_v61 = vadd.f32 %v1596_v34, %v1498_v8  ;;  %v3499_v48 = vlaneseq }
 0x4f1   : > { %v1598_v7 = vpop.f32.mrf.mxu1  ;;  %v1679_v44 = vpop.f32.mrf.mxu0 }
 0x4f2   : > { %v1693_v0 = vadd.f32 %v3348_v58, %v3346_v27  ;;  %v1599_v10 = vadd.f32 %v1598_v7, %v1498_v8  ;;  %v3352_v12 = vadd.f32 %v1679_v44, %v1591_v15  ;;  %v1741_v39 = vshrl.u32 %v3499_v48, 7 }
 0x4f3   : > { %v1681_v11 = vpop.f32.mrf.mxu0  ;;  %v1685_v4 = vpop.f32.mrf.mxu1 }
 0x4f4   : > { %v3354_v21 = vadd.f32 %v1681_v11, %v1593_v14  ;;  %1694 = vadd.xlane.f32.xlu0 %v1693_v0  ;;  %v3358_v37 = vadd.f32 %v1685_v4, %v1597_v61  ;;  %v1742_v14 = vsub.s32 0, %v1741_v39 }
 0x4f5   : > { %v1687_v18 = vpop.f32.mrf.mxu1 }
 0x4f6   : > { %v1696_v23 = vadd.f32 %v3354_v21, %v3352_v12  ;;  %v3360_v13 = vadd.f32 %v1687_v18, %v1599_v10  ;;  %v1713_v10 = vld [vmem:[%s3457_s7 + $0x10] sm:$0xff]  ;;  %v1711_v18 = vld [vmem:[%s3457_s7] sm:$0xff] }
 0x4f8   : > { %v1699_v54 = vadd.f32 %v3360_v13, %v3358_v37  ;;  %1697 = vadd.xlane.f32.xlu0 %v1696_v23 }
 0x4fa   : > { %1700 = vadd.xlane.f32.xlu1 %v1699_v54 }
 0x50e   : > { %1768 = vrot.lane.b32.xlu0 %v1767_v40, %s2118_s17  ;;  %v1712_v40 = vld [vmem:[%s3457_s7 + $0x8] sm:$0xff] }
 0x579   : > { %v1692_v63 = vpop.xlane.xlu1 %1691 }
 0x57a   : > { %v1703_v30 = vmul.f32 0.00390625, %v1692_v63 }
 0x57c   : > { %v1720_v47 = vmul.f32 %v1707_v57, %v1703_v30 }
 0x57d   : > { %v1695_v51 = vpop.xlane.xlu0 %1694 }
 0x57e   : > { %v1704_v25 = vmul.f32 0.00390625, %v1695_v51  ;;  %v1725_v50 = vsel %vm1724_vm14, %v1720_v47, 0.0  ;;  %v1753_v28 = vsel %vm1752_vm15, %v1720_v47, 0.0 }
 0x580   : > { %v1721_v19 = vmul.f32 %v1708_v1, %v1704_v25 }
 0x581   : > { %v1698_v20 = vpop.xlane.xlu0 %1697 }
 0x582   : > { %v1726_v38 = vsel %vm1724_vm14, %v1721_v19, 0.0  ;;  %v1754_v36 = vsel %vm1752_vm15, %v1721_v19, 0.0  ;;  %v1705_v43 = vmul.f32 0.00390625, %v1698_v20  ;;  %v1716_v20 = vld [vmem:[%s3458_s8] sm:$0xff] }
 0x583   : > { %v1727_v60 = vadd.f32 %v1726_v38, %v1725_v50  ;;  %v1701_v17 = vpop.xlane.xlu1 %1700  ;;  %v1755_v59 = vadd.f32 %v1754_v36, %v1753_v28 }
 0x584   : > { %v1722_v55 = vmul.f32 %v1709_v49, %v1705_v43  ;;  %v1706_v22 = vmul.f32 0.00390625, %v1701_v17  ;;  %v1718_v49 = vld [vmem:[%s3458_s8 + $0x10] sm:$0xff] }
 0x585   : > { %v1769_v44 = vpop.permute.xlu0 %1768 }
 0x586   : > { %v1728_v46 = vsel %vm1724_vm14, %v1722_v55, 0.0  ;;  %v1756_v6 = vsel %vm1752_vm15, %v1722_v55, 0.0  ;;  %v1723_v24 = vmul.f32 %v1710_v33, %v1706_v22 }
 0x587   : > { %v1729_v52 = vadd.f32 %v1728_v46, %v1727_v60  ;;  %v1757_v62 = vadd.f32 %v1756_v6, %v1755_v59  ;;  %v1717_v60 = vld [vmem:[%s3458_s8 + $0x8] sm:$0xff]  ;;  %v1719_v46 = vld [vmem:[%s3458_s8 + $0x18] sm:$0xff] }
 0x588   : > { %v1730_v2 = vsel %vm1724_vm14, %v1723_v24, 0.0  ;;  %v1758_v31 = vsel %vm1752_vm15, %v1723_v24, 0.0 }
 0x589   : > { %v1731_v32 = vadd.f32 %v1730_v2, %v1729_v52  ;;  %v1759_v16 = vadd.f32 %v1758_v31, %v1757_v62 }
 0x58b   : > { %v1732_v29 = vrot.slane %v1731_v32, 4  ;;  %v1760_v42 = vrot.slane %v1759_v16, 4 }
 0x58d   : > { %v1733_v35 = vadd.f32 %v1732_v29, %v1731_v32  ;;  %v1761_v41 = vadd.f32 %v1760_v42, %v1759_v16 }
 0x58f   : > { %v1734_v5 = vrot.slane %v1733_v35, 2  ;;  %v1762_v9 = vrot.slane %v1761_v41, 2 }
 0x591   : > { %v1735_v56 = vadd.f32 %v1734_v5, %v1733_v35  ;;  %v1763_v53 = vadd.f32 %v1762_v9, %v1761_v41 }
 0x593   : > { %v1736_v34 = vrot.slane %v1735_v56, 1  ;;  %v1764_v7 = vrot.slane %v1763_v53, 1 }
 0x595   : > { %v1737_v8 = vadd.f32 %v1736_v34, %v1735_v56  ;;  %v1765_v15 = vadd.f32 %v1764_v7, %v1763_v53 }
 0x597   : > { %v1738_v0 = vadd.f32 %v1737_v8, %v1715_v45  ;;  %v1771_v11 = vadd.f32 %v1769_v44, %v1765_v15  ;;  %v1714_v45 = vld [vmem:[%s3457_s7 + $0x18] sm:$0xff]  ;;  %v2091_v8 = vld [vmem:[%s2185_s14] sm:$0xff] }
 0x599   : > { %v1739_v4 = vmax.f32 %v1738_v0, 0.0  ;;  %v1772_v61 = vmax.f32 %v1771_v11, 0.0 }
 0x59b   : > { %v1743_v23 = vrot.slane %v1739_v4, %v1742_v14  ;;  %v1776_v54 = vrot.slane %v1772_v61, %v1742_v14  ;;  %v2092_v14 = vld [vmem:[%s2185_s14 + $0x8] sm:$0xff] }
 0x59d   : > { %v1779_v63 = vmul.f32 %v1776_v54, %v1713_v10  ;;  %v1777_v30 = vmul.f32 %v1776_v54, %v1711_v18  ;;  %v1746_v57 = vmul.f32 %v1743_v23, %v1713_v10  ;;  %v1744_v1 = vmul.f32 %v1743_v23, %v1711_v18  ;;  %v2093_v18 = vld [vmem:[%s2185_s14 + $0x10] sm:$0xff] }
 0x59e   : > { %v1745_v51 = vmul.f32 %v1743_v23, %v1712_v40  ;;  %v1747_v47 = vmul.f32 %v1743_v23, %v1714_v45  ;;  %v1778_v25 = vmul.f32 %v1776_v54, %v1712_v40  ;;  %v1780_v19 = vmul.f32 %v1776_v54, %v1714_v45  ;;  %v2094_v54 = vld [vmem:[%s2185_s14 + $0x18] sm:$0xff]  ;;  %v2096_v45 = vld [vmem:[%s2185_s14 + $0x28] sm:$0xff] }
 0x59f   : > { %1789 = vrot.lane.b32.xlu0 %v1779_v63, %s2110_s18  ;;  %1785 = vrot.lane.b32.xlu1 %v1777_v30, %s2110_s18  ;;  %v1750_v50 = vadd.f32 %v1746_v57, %v1718_v49  ;;  %v1748_v38 = vadd.f32 %v1744_v1, %v1716_v20 }
 0x5a0   : > { %v1749_v22 = vadd.f32 %v1745_v51, %v1717_v60  ;;  %v1751_v52 = vadd.f32 %v1747_v47, %v1719_v46  ;;  %v2098_v51 = vld [vmem:[%s2185_s14 + $0x38] sm:$0xff] }
 0x5a3   : > { %1787 = vrot.lane.b32.xlu1 %v1778_v25, %s2110_s18 }
 0x5a7   : > { %1791 = vrot.lane.b32.xlu1 %v1780_v19, %s2110_s18 }
 0x611   : > { %v1790_v36 = vpop.permute.xlu0 %1789  ;;  %v1786_v43 = vpop.permute.xlu1 %1785 }
 0x612   : > { %v1799_v33 = vadd.f32 %v1790_v36, %v1750_v50  ;;  %v1797_v17 = vadd.f32 %v1786_v43, %v1748_v38 }
 0x614   : > { %v2039_v28 = vmul.f32 -1.442695, %v1799_v33  ;;  %v2037_v55 = vmul.f32 -1.442695, %v1797_v17 }
 0x615   : > { %v1788_v59 = vpop.permute.xlu1 %1787 }
 0x616   : > { %2075 = vpow2.f32 %v2039_v28  ;;  %v1798_v6 = vadd.f32 %v1788_v59, %v1749_v22 }
 0x617   : > { %2077 = vpow2.f32 %v2037_v55 }
 0x618   : > { %v2038_v24 = vmul.f32 -1.442695, %v1798_v6 }
 0x619   : > { %v1792_v62 = vpop.permute.xlu1 %1791 }
 0x61a   : > { %2079 = vpow2.f32 %v2038_v24  ;;  %v1800_v2 = vadd.f32 %v1792_v62, %v1751_v52 }
 0x61c   : > { %v2040_v31 = vmul.f32 -1.442695, %v1800_v2 }
 0x61e   : > { %2081 = vpow2.f32 %v2040_v31 }
 0x623   : > { %v2076_v32 = vpop.eup %2075 }
 0x624   : > { %v2078_v16 = vpop.eup %2077  ;;  %v1815_v35 = vadd.f32 1.0, %v2076_v32 }
 0x625   : > { %v1813_v29 = vadd.f32 1.0, %v2078_v16 }
 0x627   : > { %v2080_v42 = vpop.eup %2079  ;;  %2083 = vrcp.f32 %v1813_v29 }
 0x628   : > { %v1814_v41 = vadd.f32 1.0, %v2080_v42 }
 0x62a   : > { %2085 = vrcp.f32 %v1814_v41 }
 0x62b   : > { %v2082_v5 = vpop.eup %2081  ;;  %2087 = vrcp.f32 %v1815_v35 }
 0x62c   : > { %v1816_v9 = vadd.f32 1.0, %v2082_v5 }
 0x62e   : > { %2089 = vrcp.f32 %v1816_v9 }
 0x634   : > { %v2084_v56 = vpop.eup %2083 }
 0x635   : > { %1827 = vperm.xlu0 %2073, %v2084_v56  }
 0x637   : > { %v2086_v53 = vpop.eup %2085 }
 0x638   : > { %v2088_v34 = vpop.eup %2087  ;;  %1832 = vperm.xlu1 %2074, %v2086_v53  }
 0x639   : > { %1837 = vperm.xlu0 %2073, %v2088_v34  }
 0x63b   : > { %v2090_v48 = vpop.eup %2089 }
 0x63c   : > { %1842 = vperm.xlu1 %2074, %v2090_v48  }
 0x6b0   : > { %v1828_v39 = vpop.permute.xlu0 %1827 }
 0x6b1   : > { %v1845_v7 = vmul.f32 %v1828_v39, %v3340_v26  ;;  %v1846_v44 = vmul.f32 %v1828_v39, %v3342_v3 }
 0x6b3   : > { %v1853_v15 = vadd.f32 %v2091_v8, %v1845_v7  ;;  %v1854_v0 = vadd.f32 %v2092_v14, %v1846_v44  ;;  %v1833_v11 = vpop.permute.xlu1 %1832 }
 0x6b4   : > { %v1847_v26 = vmul.f32 %v1833_v11, %v3346_v27  ;;  %v1848_v3 = vmul.f32 %v1833_v11, %v3348_v58  ;;  %v1838_v4 = vpop.permute.xlu0 %1837  ;;  %v2095_v27 = vld [vmem:[%s2185_s14 + $0x20] sm:$0xff] }
 0x6b5   : > { %1861 = vst [vmem:[%s3423_s28] sm:$0xff] %v1853_v15  ;;  %1862 = vst [vmem:[%s3423_s28 + $0x8] sm:$0xff] %v1854_v0  ;;  %v1849_v61 = vmul.f32 %v1838_v4, %v3352_v12  ;;  %v1850_v10 = vmul.f32 %v1838_v4, %v3354_v21  ;;  %v2097_v21 = vld [vmem:[%s2185_s14 + $0x30] sm:$0xff] }
 0x6b6   : > { %v1855_v23 = vadd.f32 %v2093_v18, %v1847_v26  ;;  %v1856_v40 = vadd.f32 %v2094_v54, %v1848_v3 }
 0x6b7   : > { %v1857_v58 = vadd.f32 %v2095_v27, %v1849_v61  ;;  %v1858_v63 = vadd.f32 %v2096_v45, %v1850_v10  ;;  %v1843_v30 = vpop.permute.xlu1 %1842 }
 0x6b8   : > { %1863 = vst [vmem:[%s3423_s28 + $0x10] sm:$0xff] %v1855_v23  ;;  %1864 = vst [vmem:[%s3423_s28 + $0x18] sm:$0xff] %v1856_v40  ;;  %v1851_v12 = vmul.f32 %v1843_v30, %v3358_v37  ;;  %v1852_v57 = vmul.f32 %v1843_v30, %v3360_v13 }
 0x6b9   : > { %1865 = vst [vmem:[%s3423_s28 + $0x20] sm:$0xff] %v1857_v58  ;;  %1866 = vst [vmem:[%s3423_s28 + $0x28] sm:$0xff] %v1858_v63 }
 0x6ba   : > { %v1859_v1 = vadd.f32 %v2097_v21, %v1851_v12  ;;  %v1860_v47 = vadd.f32 %v2098_v51, %v1852_v57 }
 0x6bc   : > { %1867 = vst [vmem:[%s3423_s28 + $0x30] sm:$0xff] %v1859_v1  ;;  %1868 = vst [vmem:[%s3423_s28 + $0x38] sm:$0xff] %v1860_v47 }
 0x6bd PF: > { %s19_s30 = sadd.s32 1, %s2105_s30  }
 0x6be   : > { %p16_p4 = scmp.ge.s32.totalorder %s19_s30, 4  }
 0x6c0   :  { %18 = sbr.rel (!%p16_p4) target bundleno = 1 (0x1), region = 86 }

</bundles_post_ra>
